<compile_context>
chip_gen: v7x
topology: tpu7x:2x2x1
jax: 0.10.0
libtpu: 0.0.40
codegen_flags: <defaults>
</compile_context>

<pallas_src>
import functools

import numpy as np
import jax
import jax.numpy as jnp
from jax import lax
from jax.experimental import pallas as pl
from jax.experimental.pallas import tpu as pltpu

K_NEIGHBORS = 3
BN_EPS = 1e-5
LANE = 128
BIG = 1e30  # cross-batch / knocked-out distance sentinel


def _round_up(x, k):
    return (x + k - 1) // k * k


# ---------------------------------------------------------------------------
# Fused kernel (single step, whole arrays resident in VMEM)
# ---------------------------------------------------------------------------
def aligner_kernel(tgt_c4_ref, src_ct_ref, tgt_f_ref, src_f_ref,
                   w1_ref, b1_ref, w2_ref, b2_ref, axsel_ref,
                   tok_ref, pos_ref, *,
                   batch, n, m, c2, num_token, max_token, origin, max_pos):
    tgt_c4 = tgt_c4_ref[...]          # (B*n, 4) f32; col 3 holds (1 - origin)
    src_ct = src_ct_ref[...]          # (3, B*m) f32
    big_n = tgt_c4.shape[0]
    big_m = src_ct.shape[1]

    # ---- pairwise squared distances: direct per-axis differences (exact) ----
    dx = tgt_c4[:, 0:1] - src_ct[0:1, :]
    dy = tgt_c4[:, 1:2] - src_ct[1:2, :]
    dz = tgt_c4[:, 2:3] - src_ct[2:3, :]
    d2 = dx * dx + dy * dy + dz * dz                               # (B*n, B*m)

    # ---- batch-fold mask: cross-batch pairs pushed to BIG -------------------
    row_i = lax.broadcasted_iota(jnp.int32, (big_n, big_m), 0).astype(jnp.float32)
    col_i = lax.broadcasted_iota(jnp.int32, (big_n, big_m), 1).astype(jnp.float32)
    row_b = jnp.floor((row_i + 0.5) * (1.0 / n))
    col_b = jnp.floor((col_i + 0.5) * (1.0 / m))
    d2 = jnp.where(row_b == col_b, d2, BIG)

    # ---- 3-NN: one XLU min per neighbour; sqrt / EUP recip on (N,1) minima --
    w = jnp.zeros((big_n, big_m), jnp.float32)
    dwork = d2
    for _ in range(K_NEIGHBORS):
        mn2 = jnp.min(dwork, axis=1, keepdims=True)                 # (N, 1)
        inv = pl.reciprocal(jnp.sqrt(mn2) + 1e-6, approx=True)      # EUP slot
        sel = dwork == mn2                                          # exact hit
        w = w + jnp.where(sel, inv, 0.0)
        dwork = jnp.where(sel, BIG, dwork)
    w = w * pl.reciprocal(jnp.sum(w, axis=1, keepdims=True), approx=True)

    # interpolated features: (B*n, B*m) @ (B*m, C2); cross-batch weights are 0
    interp = jnp.dot(w, src_f_ref[...], preferred_element_type=jnp.float32)

    # ---- SharedMLP: Conv1d(k=1) + BN(eval; scale folded into W) + ReLU, x2 --
    h = (jnp.dot(interp, w1_ref[:c2, :], preferred_element_type=jnp.float32)
         + jnp.dot(tgt_f_ref[...], w1_ref[c2:, :],
                   preferred_element_type=jnp.float32)
         + b1_ref[...])
    h = jnp.maximum(h, 0.0)
    feats = jnp.maximum(
        jnp.dot(h, w2_ref[...], preferred_element_type=jnp.float32) + b2_ref[...],
        0.0)                                                        # (B*n, Cout_p)

    # ---- sparse positional encoding: sin(cc4 @ axsel4); phase is row 3 of
    #      axsel4 and is driven by the constant-1 homogeneous coordinate ------
    cc4 = jnp.clip(jnp.floor(tgt_c4 + origin), 0.0, max_pos - 1.0)  # (B*n, 4)
    angle = jnp.dot(cc4, axsel_ref[...], preferred_element_type=jnp.float32)
    pos = jnp.sin(angle)                                            # (B*n, Cout_p)

    # ---- token packing: direct sublane-aligned stores, no concatenates ------
    for b in range(batch):
        r0 = b * n
        tok_ref[b, :num_token, :] = feats[r0:r0 + num_token, :]
        pos_ref[b, :num_token, :] = pos[r0:r0 + num_token, :]
        if num_token < max_token:
            zpad = jnp.zeros((max_token - num_token, feats.shape[1]), jnp.float32)
            tok_ref[b, num_token:, :] = zpad
            pos_ref[b, num_token:, :] = zpad


# ---------------------------------------------------------------------------
# One-time parameter prep (model init): fold BN scale into weights, pad
# channels to 128 lanes, build the phase-folded positional table.
# ---------------------------------------------------------------------------
def build_pos_table(num_pos_feats, temperature, pad_to):
    x_steps = y_steps = num_pos_feats // 3
    z_steps = num_pos_feats - x_steps - y_steps
    assert x_steps % 2 == 0 and z_steps % 2 == 0

    def axis_dimt(steps):
        i = np.arange(steps, dtype=np.float32)
        return (temperature ** (2.0 * np.floor(i / 2.0) / steps)).astype(np.float32)

    dimt = np.concatenate([axis_dimt(x_steps), axis_dimt(y_steps), axis_dimt(z_steps)])
    tab = np.zeros((4, pad_to), np.float32)
    tab[0, :x_steps] = 1.0 / dimt[:x_steps]
    tab[1, x_steps:x_steps + y_steps] = 1.0 / dimt[x_steps:x_steps + y_steps]
    tab[2, x_steps + y_steps:num_pos_feats] = 1.0 / dimt[x_steps + y_steps:]
    # phase row (pi/2 on "cos" = odd slots); padded lanes stay 0 -> sin(0) = 0
    for start, steps in ((0, x_steps), (x_steps, y_steps), (x_steps + y_steps, z_steps)):
        tab[3, start + 1:start + steps:2] = np.pi / 2.0
    return jnp.asarray(tab)


def prepare_aligner_params(w1, s1, b1, w2, s2, b2, *, num_pos_feats, temperature):
    c_in, c_mid = w1.shape
    c_out = w2.shape[1]
    c_mid_p = _round_up(c_mid, LANE)
    c_out_p = _round_up(c_out, LANE)
    w1f = jnp.pad(w1 * s1, ((0, 0), (0, c_mid_p - c_mid)))          # BN scale folded
    b1p = jnp.pad(b1, ((0, 0), (0, c_mid_p - c_mid)))
    w2f = jnp.pad(w2 * s2, ((0, c_mid_p - c_mid), (0, c_out_p - c_out)))
    b2p = jnp.pad(b2, ((0, 0), (0, c_out_p - c_out)))
    axsel4 = build_pos_table(num_pos_feats, temperature, c_out_p)   # (4, Cout_p)
    return dict(w1=w1f, b1=b1p, w2=w2f, b2=b2p, axsel=axsel4,
                c_in=c_in, c_mid_p=c_mid_p, c_out=c_out, c_out_p=c_out_p)


# ---------------------------------------------------------------------------
# Forward wrapper: batch-fold the inputs, run ONE pallas_call (no grid).
# ---------------------------------------------------------------------------
def spatial_aligner_tokens(cloud_coord, cloud_feat, image_coord, image_feat, params,
                           *, max_num_token, origin, max_pos):
    B, n, _ = cloud_coord.shape
    m = image_coord.shape[1]
    c1 = cloud_feat.shape[2]
    c2 = image_feat.shape[2]
    assert params["c_in"] == c1 + c2
    c_mid_p, c_out, c_out_p = params["c_mid_p"], params["c_out"], params["c_out_p"]
    num_token = min(max_num_token, n)

    # batch-fold inputs: rows = B*n targets, columns = B*m sources
    hom = jnp.full((B, n, 1), 1.0 - origin, jnp.float32)  # -> 1 after +origin/floor/clip
    tgt_c4 = jnp.concatenate([cloud_coord, hom], axis=-1).reshape(B * n, 4)
    src_ct = jnp.transpose(image_coord.reshape(B * m, 3))           # (3, B*m)
    tgt_f = cloud_feat.reshape(B * n, c1)
    src_f = image_feat.reshape(B * m, c2)

    kern = functools.partial(
        aligner_kernel, batch=B, n=n, m=m, c2=c2, num_token=num_token,
        max_token=max_num_token, origin=float(origin), max_pos=float(max_pos))

    inputs = (tgt_c4, src_ct, tgt_f, src_f,
              params["w1"], params["b1"], params["w2"], params["b2"], params["axsel"])

    big_n, big_m = B * n, B * m
    flops = (2 * big_n * big_m * 3 + 2 * big_n * big_m * c2
             + 2 * big_n * (c1 + c2) * c_mid_p + 2 * big_n * c_mid_p * c_out_p
             + 2 * big_n * 4 * c_out_p)
    transcendentals = big_n * c_out_p + big_n * (2 * K_NEIGHBORS + 1)
    bytes_accessed = (sum(int(np.prod(a.shape)) * 4 for a in inputs)
                      + 2 * B * max_num_token * c_out_p * 4)

    vmem_spec = pl.BlockSpec(memory_space=pltpu.MemorySpace.VMEM)
    tok_p, pos_p = pl.pallas_call(
        kern,
        out_shape=(jax.ShapeDtypeStruct((B, max_num_token, c_out_p), jnp.float32),
                   jax.ShapeDtypeStruct((B, max_num_token, c_out_p), jnp.float32)),
        in_specs=[vmem_spec] * len(inputs),
        out_specs=(vmem_spec, vmem_spec),
        cost_estimate=pl.CostEstimate(flops=flops,
                                      transcendentals=transcendentals,
                                      bytes_accessed=bytes_accessed),
    )(*inputs)

    tokens = tok_p[:, :, :c_out]
    pos_emb = pos_p[:, :, :c_out]
    token_padding_mask = jnp.ones((B, max_num_token), jnp.bool_)
    token_padding_mask = token_padding_mask.at[:, :num_token].set(False)
    return tokens, pos_emb, token_padding_mask


# ---------------------------------------------------------------------------
# Main: SpatialAligner forward with synthetic deterministic params/inputs
# ---------------------------------------------------------------------------
if __name__ == "__main__":
    B, n, m = 2, 16, 32
    C1, C2 = 16, 32                      # cloud / image feature channels
    MLPS = [C1 + C2, 64, 96]             # SharedMLP layer sizes
    OUT_CH = MLPS[-1]                    # out_channels (sparse conv skipped -> identity)
    MAX_POS = 80                         # SparsePositionalEncoding(max_pos=80)
    ORIGIN = MAX_POS // 2
    TEMP = 10000.0
    MAX_NUM_TOKEN = 24

    key = jax.random.PRNGKey(0)
    k1, k2, k3, k4, k5, k6 = jax.random.split(key, 6)
    cloud_coord = jax.random.uniform(k1, (B, n, 3), jnp.float32, -30.0, 30.0)  # sinput.C[:,1:4]
    cloud_feat = jax.random.normal(k2, (B, n, C1), jnp.float32)                # sinput.F
    image_coord = jax.random.uniform(k3, (B, m, 3), jnp.float32, -30.0, 30.0)
    image_feat = jax.random.normal(k4, (B, m, C2), jnp.float32)

    # SharedMLP params: Conv1d(k=1) weights stored transposed (C_in, C_out);
    # BatchNorm folded to per-channel scale/shift (eval mode, default stats).
    w1 = jax.random.normal(k5, (MLPS[0], MLPS[1]), jnp.float32) * 0.1
    w2 = jax.random.normal(k6, (MLPS[1], MLPS[2]), jnp.float32) * 0.1
    bn_scale = float(1.0 / np.sqrt(1.0 + BN_EPS))
    s1 = jnp.full((1, MLPS[1]), bn_scale, jnp.float32)
    b1 = jnp.zeros((1, MLPS[1]), jnp.float32)
    s2 = jnp.full((1, MLPS[2]), bn_scale, jnp.float32)
    b2 = jnp.zeros((1, MLPS[2]), jnp.float32)

    # one-time parameter prep (done at model init, not per forward)
    params = prepare_aligner_params(w1, s1, b1, w2, s2, b2,
                                    num_pos_feats=OUT_CH, temperature=TEMP)

    # --- fused Pallas forward ---
    tokens, pos_emb, token_padding_mask = spatial_aligner_tokens(
        cloud_coord, cloud_feat, image_coord, image_feat, params,
        max_num_token=MAX_NUM_TOKEN, origin=ORIGIN, max_pos=MAX_POS)
    jax.block_until_ready((tokens, pos_emb, token_padding_mask))

    # --- pure numpy f32 reference check ---
    cc, ic = np.asarray(cloud_coord), np.asarray(image_coord)
    cf, imf = np.asarray(cloud_feat), np.asarray(image_feat)
    w1_np, w2_np = np.asarray(w1), np.asarray(w2)
    ref_feats = []
    for i in range(B):
        d = np.linalg.norm(cc[i][:, None, :] - ic[i][None, :, :], axis=2)
        order = np.argsort(d, axis=1)[:, :K_NEIGHBORS]
        dsel = np.take_along_axis(d, order, axis=1)
        wgt = 1.0 / (dsel + 1e-6)
        wgt = wgt / wgt.sum(1, keepdims=True)
        interp = (imf[i][order] * wgt[:, :, None]).sum(1)
        x = np.concatenate([interp, cf[i]], axis=1).astype(np.float32)
        h = np.maximum((x @ w1_np) * bn_scale, 0.0)
        h = np.maximum((h @ w2_np) * bn_scale, 0.0)
        ref_feats.append(h)
    ref_feats = np.stack(ref_feats)

    num_token = min(MAX_NUM_TOKEN, n)
    np.testing.assert_allclose(np.asarray(tokens[:, :num_token]),
                               ref_feats[:, :num_token], rtol=5e-3, atol=5e-3)
    assert float(jnp.max(jnp.abs(tokens[:, num_token:]))) == 0.0

    def table(steps):
        p = np.arange(MAX_POS, dtype=np.float32)[:, None]
        i = np.arange(steps, dtype=np.float32)
        dt = TEMP ** (2.0 * np.floor(i / 2.0) / steps)
        v = p / dt
        return np.stack([np.sin(v[:, 0::2]), np.cos(v[:, 1::2])],
                        axis=2).reshape(MAX_POS, steps)

    xs = ys = OUT_CH // 3
    zs = OUT_CH - xs - ys
    tx, ty, tz = table(xs), table(ys), table(zs)
    idx = np.clip((cc + ORIGIN).astype(np.int64), 0, MAX_POS - 1)
    ref_pos = np.concatenate([tx[idx[:, :, 0]], ty[idx[:, :, 1]], tz[idx[:, :, 2]]],
                             axis=-1)
    np.testing.assert_allclose(np.asarray(pos_emb[:, :num_token]),
                               ref_pos[:, :num_token], rtol=1e-2, atol=1e-2)
    assert float(jnp.max(jnp.abs(pos_emb[:, num_token:]))) == 0.0

    assert tokens.shape == (B, MAX_NUM_TOKEN, OUT_CH)
    assert pos_emb.shape == (B, MAX_NUM_TOKEN, OUT_CH)
    assert token_padding_mask.shape == (B, MAX_NUM_TOKEN)
    mask_np = np.asarray(token_padding_mask)
    assert not mask_np[:, :num_token].any() and mask_np[:, num_token:].all()
    print("KERNEL_OK")
</pallas_src>

<mosaic_0001>
module attributes {stable_mosaic.version = 11 : i64} {
  func.func @aligner_kernel(%arg0: memref<32x4xf32, #tpu.memory_space<vmem>>, %arg1: memref<3x64xf32, #tpu.memory_space<vmem>>, %arg2: memref<32x16xf32, #tpu.memory_space<vmem>>, %arg3: memref<64x32xf32, #tpu.memory_space<vmem>>, %arg4: memref<48x128xf32, #tpu.memory_space<vmem>>, %arg5: memref<1x128xf32, #tpu.memory_space<vmem>>, %arg6: memref<128x128xf32, #tpu.memory_space<vmem>>, %arg7: memref<1x128xf32, #tpu.memory_space<vmem>>, %arg8: memref<4x128xf32, #tpu.memory_space<vmem>>, %arg9: memref<2x24x128xf32, #tpu.memory_space<vmem>>, %arg10: memref<2x24x128xf32, #tpu.memory_space<vmem>>) attributes {dimension_semantics = [], scalar_prefetch = 0 : i64, scratch_operands = 0 : i64, tpu.core_type = #tpu.core_type<tc>} {
    %c0 = arith.constant 0 : index
    %c0_0 = arith.constant 0 : index
    %0 = vector.load %arg0[%c0, %c0_0] : memref<32x4xf32, #tpu.memory_space<vmem>>, vector<32x4xf32>
    %c0_1 = arith.constant 0 : index
    %c0_2 = arith.constant 0 : index
    %1 = vector.load %arg1[%c0_1, %c0_2] : memref<3x64xf32, #tpu.memory_space<vmem>>, vector<3x64xf32>
    %2 = vector.extract_strided_slice %0 {offsets = [0, 0], sizes = [32, 1], strides = [1, 1]} : vector<32x4xf32> to vector<32x1xf32>
    %3 = vector.extract_strided_slice %1 {offsets = [0, 0], sizes = [1, 64], strides = [1, 1]} : vector<3x64xf32> to vector<1x64xf32>
    %4 = vector.broadcast %2 : vector<32x1xf32> to vector<32x64xf32>
    %5 = vector.broadcast %3 : vector<1x64xf32> to vector<32x64xf32>
    %6 = arith.subf %4, %5 : vector<32x64xf32>
    %7 = vector.extract_strided_slice %0 {offsets = [0, 1], sizes = [32, 1], strides = [1, 1]} : vector<32x4xf32> to vector<32x1xf32>
    %8 = vector.extract_strided_slice %1 {offsets = [1, 0], sizes = [1, 64], strides = [1, 1]} : vector<3x64xf32> to vector<1x64xf32>
    %9 = vector.broadcast %7 : vector<32x1xf32> to vector<32x64xf32>
    %10 = vector.broadcast %8 : vector<1x64xf32> to vector<32x64xf32>
    %11 = arith.subf %9, %10 : vector<32x64xf32>
    %12 = vector.extract_strided_slice %0 {offsets = [0, 2], sizes = [32, 1], strides = [1, 1]} : vector<32x4xf32> to vector<32x1xf32>
    %13 = vector.extract_strided_slice %1 {offsets = [2, 0], sizes = [1, 64], strides = [1, 1]} : vector<3x64xf32> to vector<1x64xf32>
    %14 = vector.broadcast %12 : vector<32x1xf32> to vector<32x64xf32>
    %15 = vector.broadcast %13 : vector<1x64xf32> to vector<32x64xf32>
    %16 = arith.subf %14, %15 : vector<32x64xf32>
    %17 = arith.mulf %6, %6 : vector<32x64xf32>
    %18 = arith.mulf %11, %11 : vector<32x64xf32>
    %19 = arith.addf %17, %18 : vector<32x64xf32>
    %20 = arith.mulf %16, %16 : vector<32x64xf32>
    %21 = arith.addf %19, %20 : vector<32x64xf32>
    %22 = tpu.iota {dimensions = array<i32: 0>} : vector<32x64xi32>
    %23 = arith.sitofp %22 : vector<32x64xi32> to vector<32x64xf32>
    %24 = tpu.iota {dimensions = array<i32: 1>} : vector<32x64xi32>
    %25 = arith.sitofp %24 : vector<32x64xi32> to vector<32x64xf32>
    %cst = arith.constant 5.000000e-01 : f32
    %26 = vector.broadcast %cst : f32 to vector<32x64xf32>
    %27 = arith.addf %23, %26 : vector<32x64xf32>
    %cst_3 = arith.constant 6.250000e-02 : f32
    %28 = vector.broadcast %cst_3 : f32 to vector<32x64xf32>
    %29 = arith.mulf %27, %28 : vector<32x64xf32>
    %30 = math.floor %29 : vector<32x64xf32>
    %cst_4 = arith.constant 5.000000e-01 : f32
    %31 = vector.broadcast %cst_4 : f32 to vector<32x64xf32>
    %32 = arith.addf %25, %31 : vector<32x64xf32>
    %cst_5 = arith.constant 3.125000e-02 : f32
    %33 = vector.broadcast %cst_5 : f32 to vector<32x64xf32>
    %34 = arith.mulf %32, %33 : vector<32x64xf32>
    %35 = math.floor %34 : vector<32x64xf32>
    %36 = arith.cmpf oeq, %30, %35 : vector<32x64xf32>
    %cst_6 = arith.constant 1.000000e+30 : f32
    %37 = vector.broadcast %cst_6 : f32 to vector<32x64xf32>
    %38 = arith.select %36, %21, %37 : vector<32x64xi1>, vector<32x64xf32>
    %cst_7 = arith.constant 0.000000e+00 : f32
    %39 = vector.broadcast %cst_7 : f32 to vector<32x64xf32>
    %cst_8 = arith.constant dense<0x7F800000> : vector<32xf32>
    %40 = vector.multi_reduction <minimumf>, %38, %cst_8 [1] : vector<32x64xf32> to vector<32xf32>
    %41 = vector.shape_cast %40 : vector<32xf32> to vector<32x1xf32>
    %42 = math.sqrt %41 : vector<32x1xf32>
    %cst_9 = arith.constant 9.99999997E-7 : f32
    %43 = vector.broadcast %cst_9 : f32 to vector<32x1xf32>
    %44 = arith.addf %42, %43 : vector<32x1xf32>
    %45 = tpu.reciprocal %44 {approx = true} : vector<32x1xf32> -> vector<32x1xf32>
    %46 = vector.broadcast %41 : vector<32x1xf32> to vector<32x64xf32>
    %47 = arith.cmpf oeq, %38, %46 : vector<32x64xf32>
    %cst_10 = arith.constant 0.000000e+00 : f32
    %48 = vector.shape_cast %45 : vector<32x1xf32> to vector<32x1xf32>
    %49 = vector.broadcast %48 : vector<32x1xf32> to vector<32x64xf32>
    %50 = vector.broadcast %cst_10 : f32 to vector<32x64xf32>
    %51 = arith.select %47, %49, %50 : vector<32x64xi1>, vector<32x64xf32>
    %52 = arith.addf %39, %51 : vector<32x64xf32>
    %cst_11 = arith.constant 1.000000e+30 : f32
    %53 = vector.broadcast %cst_11 : f32 to vector<32x64xf32>
    %54 = arith.select %47, %53, %38 : vector<32x64xi1>, vector<32x64xf32>
    %cst_12 = arith.constant dense<0x7F800000> : vector<32xf32>
    %55 = vector.multi_reduction <minimumf>, %54, %cst_12 [1] : vector<32x64xf32> to vector<32xf32>
    %56 = vector.shape_cast %55 : vector<32xf32> to vector<32x1xf32>
    %57 = math.sqrt %56 : vector<32x1xf32>
    %cst_13 = arith.constant 9.99999997E-7 : f32
    %58 = vector.broadcast %cst_13 : f32 to vector<32x1xf32>
    %59 = arith.addf %57, %58 : vector<32x1xf32>
    %60 = tpu.reciprocal %59 {approx = true} : vector<32x1xf32> -> vector<32x1xf32>
    %61 = vector.broadcast %56 : vector<32x1xf32> to vector<32x64xf32>
    %62 = arith.cmpf oeq, %54, %61 : vector<32x64xf32>
    %cst_14 = arith.constant 0.000000e+00 : f32
    %63 = vector.shape_cast %60 : vector<32x1xf32> to vector<32x1xf32>
    %64 = vector.broadcast %63 : vector<32x1xf32> to vector<32x64xf32>
    %65 = vector.broadcast %cst_14 : f32 to vector<32x64xf32>
    %66 = arith.select %62, %64, %65 : vector<32x64xi1>, vector<32x64xf32>
    %67 = arith.addf %52, %66 : vector<32x64xf32>
    %cst_15 = arith.constant 1.000000e+30 : f32
    %68 = vector.broadcast %cst_15 : f32 to vector<32x64xf32>
    %69 = arith.select %62, %68, %54 : vector<32x64xi1>, vector<32x64xf32>
    %cst_16 = arith.constant dense<0x7F800000> : vector<32xf32>
    %70 = vector.multi_reduction <minimumf>, %69, %cst_16 [1] : vector<32x64xf32> to vector<32xf32>
    %71 = vector.shape_cast %70 : vector<32xf32> to vector<32x1xf32>
    %72 = math.sqrt %71 : vector<32x1xf32>
    %cst_17 = arith.constant 9.99999997E-7 : f32
    %73 = vector.broadcast %cst_17 : f32 to vector<32x1xf32>
    %74 = arith.addf %72, %73 : vector<32x1xf32>
    %75 = tpu.reciprocal %74 {approx = true} : vector<32x1xf32> -> vector<32x1xf32>
    %76 = vector.broadcast %71 : vector<32x1xf32> to vector<32x64xf32>
    %77 = arith.cmpf oeq, %69, %76 : vector<32x64xf32>
    %cst_18 = arith.constant 0.000000e+00 : f32
    %78 = vector.shape_cast %75 : vector<32x1xf32> to vector<32x1xf32>
    %79 = vector.broadcast %78 : vector<32x1xf32> to vector<32x64xf32>
    %80 = vector.broadcast %cst_18 : f32 to vector<32x64xf32>
    %81 = arith.select %77, %79, %80 : vector<32x64xi1>, vector<32x64xf32>
    %82 = arith.addf %67, %81 : vector<32x64xf32>
    %cst_19 = arith.constant dense<0.000000e+00> : vector<32xf32>
    %83 = vector.multi_reduction <add>, %82, %cst_19 [1] : vector<32x64xf32> to vector<32xf32>
    %84 = vector.shape_cast %83 : vector<32xf32> to vector<32x1xf32>
    %85 = tpu.reciprocal %84 {approx = true} : vector<32x1xf32> -> vector<32x1xf32>
    %86 = vector.broadcast %85 : vector<32x1xf32> to vector<32x64xf32>
    %87 = arith.mulf %82, %86 : vector<32x64xf32>
    %c0_20 = arith.constant 0 : index
    %c0_21 = arith.constant 0 : index
    %88 = vector.load %arg3[%c0_20, %c0_21] : memref<64x32xf32, #tpu.memory_space<vmem>>, vector<64x32xf32>
    %cst_22 = arith.constant dense<0.000000e+00> : vector<32x32xf32>
    %89 = tpu.matmul %87, %88, %cst_22 {dimension_numbers = #tpu.dot_dimension_numbers<[1], [0], [0], [1], [0, 0, 1, 1], [], []>} : vector<32x64xf32>, vector<64x32xf32>, vector<32x32xf32> -> vector<32x32xf32>
    %c0_23 = arith.constant 0 : index
    %c0_24 = arith.constant 0 : index
    %90 = vector.load %arg4[%c0_23, %c0_24] : memref<48x128xf32, #tpu.memory_space<vmem>>, vector<32x128xf32>
    %cst_25 = arith.constant dense<0.000000e+00> : vector<32x128xf32>
    %91 = tpu.matmul %89, %90, %cst_25 {dimension_numbers = #tpu.dot_dimension_numbers<[1], [0], [0], [1], [0, 0, 1, 1], [], []>} : vector<32x32xf32>, vector<32x128xf32>, vector<32x128xf32> -> vector<32x128xf32>
    %c0_26 = arith.constant 0 : index
    %c0_27 = arith.constant 0 : index
    %92 = vector.load %arg2[%c0_26, %c0_27] : memref<32x16xf32, #tpu.memory_space<vmem>>, vector<32x16xf32>
    %c32 = arith.constant 32 : index
    %c0_28 = arith.constant 0 : index
    %93 = vector.load %arg4[%c32, %c0_28] : memref<48x128xf32, #tpu.memory_space<vmem>>, vector<16x128xf32>
    %cst_29 = arith.constant dense<0.000000e+00> : vector<32x128xf32>
    %94 = tpu.matmul %92, %93, %cst_29 {dimension_numbers = #tpu.dot_dimension_numbers<[1], [0], [0], [1], [0, 0, 1, 1], [], []>} : vector<32x16xf32>, vector<16x128xf32>, vector<32x128xf32> -> vector<32x128xf32>
    %95 = arith.addf %91, %94 : vector<32x128xf32>
    %c0_30 = arith.constant 0 : index
    %c0_31 = arith.constant 0 : index
    %96 = vector.load %arg5[%c0_30, %c0_31] : memref<1x128xf32, #tpu.memory_space<vmem>>, vector<1x128xf32>
    %97 = vector.broadcast %96 : vector<1x128xf32> to vector<32x128xf32>
    %98 = arith.addf %95, %97 : vector<32x128xf32>
    %cst_32 = arith.constant 0.000000e+00 : f32
    %99 = vector.broadcast %cst_32 : f32 to vector<32x128xf32>
    %100 = arith.maximumf %98, %99 : vector<32x128xf32>
    %c0_33 = arith.constant 0 : index
    %c0_34 = arith.constant 0 : index
    %101 = vector.load %arg6[%c0_33, %c0_34] : memref<128x128xf32, #tpu.memory_space<vmem>>, vector<128x128xf32>
    %cst_35 = arith.constant dense<0.000000e+00> : vector<32x128xf32>
    %102 = tpu.matmul %100, %101, %cst_35 {dimension_numbers = #tpu.dot_dimension_numbers<[1], [0], [0], [1], [0, 0, 1, 1], [], []>} : vector<32x128xf32>, vector<128x128xf32>, vector<32x128xf32> -> vector<32x128xf32>
    %c0_36 = arith.constant 0 : index
    %c0_37 = arith.constant 0 : index
    %103 = vector.load %arg7[%c0_36, %c0_37] : memref<1x128xf32, #tpu.memory_space<vmem>>, vector<1x128xf32>
    %104 = vector.broadcast %103 : vector<1x128xf32> to vector<32x128xf32>
    %105 = arith.addf %102, %104 : vector<32x128xf32>
    %cst_38 = arith.constant 0.000000e+00 : f32
    %106 = vector.broadcast %cst_38 : f32 to vector<32x128xf32>
    %107 = arith.maximumf %105, %106 : vector<32x128xf32>
    %cst_39 = arith.constant 4.000000e+01 : f32
    %108 = vector.broadcast %cst_39 : f32 to vector<32x4xf32>
    %109 = arith.addf %0, %108 : vector<32x4xf32>
    %110 = math.floor %109 : vector<32x4xf32>
    %cst_40 = arith.constant 0.000000e+00 : f32
    %cst_41 = arith.constant 7.900000e+01 : f32
    %111 = vector.broadcast %cst_40 : f32 to vector<32x4xf32>
    %112 = arith.maximumf %111, %110 : vector<32x4xf32>
    %113 = vector.broadcast %cst_41 : f32 to vector<32x4xf32>
    %114 = arith.minimumf %113, %112 : vector<32x4xf32>
    %c0_42 = arith.constant 0 : index
    %c0_43 = arith.constant 0 : index
    %115 = vector.load %arg8[%c0_42, %c0_43] : memref<4x128xf32, #tpu.memory_space<vmem>>, vector<4x128xf32>
    %cst_44 = arith.constant dense<0.000000e+00> : vector<32x128xf32>
    %116 = tpu.matmul %114, %115, %cst_44 {dimension_numbers = #tpu.dot_dimension_numbers<[1], [0], [0], [1], [0, 0, 1, 1], [], []>} : vector<32x4xf32>, vector<4x128xf32>, vector<32x128xf32> -> vector<32x128xf32>
    %117 = math.sin %116 : vector<32x128xf32>
    %118 = vector.extract_strided_slice %107 {offsets = [0, 0], sizes = [16, 128], strides = [1, 1]} : vector<32x128xf32> to vector<16x128xf32>
    %c0_45 = arith.constant 0 : index
    %c0_46 = arith.constant 0 : index
    %c0_47 = arith.constant 0 : index
    %119 = vector.load %arg9[%c0_45, %c0_46, %c0_47] : memref<2x24x128xf32, #tpu.memory_space<vmem>>, vector<1x16x128xf32>
    %120 = vector.shape_cast %119 : vector<1x16x128xf32> to vector<16x128xf32>
    %121 = vector.shape_cast %118 : vector<16x128xf32> to vector<1x16x128xf32>
    tpu.vector_store %arg9[%c0_45, %c0_46, %c0_47], %121 {strides = array<i32>} : memref<2x24x128xf32, #tpu.memory_space<vmem>>, vector<1x16x128xf32>,
    %122 = vector.extract_strided_slice %117 {offsets = [0, 0], sizes = [16, 128], strides = [1, 1]} : vector<32x128xf32> to vector<16x128xf32>
    %c0_48 = arith.constant 0 : index
    %c0_49 = arith.constant 0 : index
    %c0_50 = arith.constant 0 : index
    %123 = vector.load %arg10[%c0_48, %c0_49, %c0_50] : memref<2x24x128xf32, #tpu.memory_space<vmem>>, vector<1x16x128xf32>
    %124 = vector.shape_cast %123 : vector<1x16x128xf32> to vector<16x128xf32>
    %125 = vector.shape_cast %122 : vector<16x128xf32> to vector<1x16x128xf32>
    tpu.vector_store %arg10[%c0_48, %c0_49, %c0_50], %125 {strides = array<i32>} : memref<2x24x128xf32, #tpu.memory_space<vmem>>, vector<1x16x128xf32>,
    %cst_51 = arith.constant 0.000000e+00 : f32
    %126 = vector.broadcast %cst_51 : f32 to vector<8x128xf32>
    %c0_52 = arith.constant 0 : index
    %c16 = arith.constant 16 : index
    %c0_53 = arith.constant 0 : index
    %127 = vector.load %arg9[%c0_52, %c16, %c0_53] : memref<2x24x128xf32, #tpu.memory_space<vmem>>, vector<1x8x128xf32>
    %128 = vector.shape_cast %127 : vector<1x8x128xf32> to vector<8x128xf32>
    %129 = vector.shape_cast %126 : vector<8x128xf32> to vector<1x8x128xf32>
    tpu.vector_store %arg9[%c0_52, %c16, %c0_53], %129 {strides = array<i32>} : memref<2x24x128xf32, #tpu.memory_space<vmem>>, vector<1x8x128xf32>,
    %c0_54 = arith.constant 0 : index
    %c16_55 = arith.constant 16 : index
    %c0_56 = arith.constant 0 : index
    %130 = vector.load %arg10[%c0_54, %c16_55, %c0_56] : memref<2x24x128xf32, #tpu.memory_space<vmem>>, vector<1x8x128xf32>
    %131 = vector.shape_cast %130 : vector<1x8x128xf32> to vector<8x128xf32>
    %132 = vector.shape_cast %126 : vector<8x128xf32> to vector<1x8x128xf32>
    tpu.vector_store %arg10[%c0_54, %c16_55, %c0_56], %132 {strides = array<i32>} : memref<2x24x128xf32, #tpu.memory_space<vmem>>, vector<1x8x128xf32>,
    %133 = vector.extract_strided_slice %107 {offsets = [16, 0], sizes = [16, 128], strides = [1, 1]} : vector<32x128xf32> to vector<16x128xf32>
    %c1 = arith.constant 1 : index
    %c0_57 = arith.constant 0 : index
    %c0_58 = arith.constant 0 : index
    %134 = vector.load %arg9[%c1, %c0_57, %c0_58] : memref<2x24x128xf32, #tpu.memory_space<vmem>>, vector<1x16x128xf32>
    %135 = vector.shape_cast %134 : vector<1x16x128xf32> to vector<16x128xf32>
    %136 = vector.shape_cast %133 : vector<16x128xf32> to vector<1x16x128xf32>
    tpu.vector_store %arg9[%c1, %c0_57, %c0_58], %136 {strides = array<i32>} : memref<2x24x128xf32, #tpu.memory_space<vmem>>, vector<1x16x128xf32>,
    %137 = vector.extract_strided_slice %117 {offsets = [16, 0], sizes = [16, 128], strides = [1, 1]} : vector<32x128xf32> to vector<16x128xf32>
    %c1_59 = arith.constant 1 : index
    %c0_60 = arith.constant 0 : index
    %c0_61 = arith.constant 0 : index
    %138 = vector.load %arg10[%c1_59, %c0_60, %c0_61] : memref<2x24x128xf32, #tpu.memory_space<vmem>>, vector<1x16x128xf32>
    %139 = vector.shape_cast %138 : vector<1x16x128xf32> to vector<16x128xf32>
    %140 = vector.shape_cast %137 : vector<16x128xf32> to vector<1x16x128xf32>
    tpu.vector_store %arg10[%c1_59, %c0_60, %c0_61], %140 {strides = array<i32>} : memref<2x24x128xf32, #tpu.memory_space<vmem>>, vector<1x16x128xf32>,
    %cst_62 = arith.constant 0.000000e+00 : f32
    %141 = vector.broadcast %cst_62 : f32 to vector<8x128xf32>
    %c1_63 = arith.constant 1 : index
    %c16_64 = arith.constant 16 : index
    %c0_65 = arith.constant 0 : index
    %142 = vector.load %arg9[%c1_63, %c16_64, %c0_65] : memref<2x24x128xf32, #tpu.memory_space<vmem>>, vector<1x8x128xf32>
    %143 = vector.shape_cast %142 : vector<1x8x128xf32> to vector<8x128xf32>
    %144 = vector.shape_cast %141 : vector<8x128xf32> to vector<1x8x128xf32>
    tpu.vector_store %arg9[%c1_63, %c16_64, %c0_65], %144 {strides = array<i32>} : memref<2x24x128xf32, #tpu.memory_space<vmem>>, vector<1x8x128xf32>,
    %c1_66 = arith.constant 1 : index
    %c16_67 = arith.constant 16 : index
    %c0_68 = arith.constant 0 : index
    %145 = vector.load %arg10[%c1_66, %c16_67, %c0_68] : memref<2x24x128xf32, #tpu.memory_space<vmem>>, vector<1x8x128xf32>
    %146 = vector.shape_cast %145 : vector<1x8x128xf32> to vector<8x128xf32>
    %147 = vector.shape_cast %141 : vector<8x128xf32> to vector<1x8x128xf32>
    tpu.vector_store %arg10[%c1_66, %c16_67, %c0_68], %147 {strides = array<i32>} : memref<2x24x128xf32, #tpu.memory_space<vmem>>, vector<1x8x128xf32>,
    return
  }
}

</mosaic_0001>

<bundles_post_ra>
// kernel: tpu_custom_call.1
= control target key start
LH: loop header
LB: loop body
LE: loop exit
PB: predicated region body
PF: predicated region fallthrough
CT: control target
= control target key end

     0   :  { %16 = vsyncpa [#allocation3], 0  ;;  %v1801_v2 = vmov 1   ;;  %v1802_v3 = vmov 0   ;;  %s2517_s0 = inlined_call_operand.vmem [shape: f32[32,4], index: 0, kind: input, shape index: {}]   ;;  %s2518_s1 = inlined_call_operand.vmem [shape: f32[3,64], index: 1, kind: input, shape index: {}]   ;;  %s2519_s2 = inlined_call_operand.vmem [shape: f32[32,16], index: 2, kind: input, shape index: {}]   ;;  %s2520_s3 = inlined_call_operand.vmem [shape: f32[64,32], index: 3, kind: input, shape index: {}]   ;;  %s2521_s4 = inlined_call_operand.vmem [shape: f32[48,128], index: 4, kind: input, shape index: {}]   ;;  %s2522_s5 = inlined_call_operand.vmem [shape: f32[1,128], index: 5, kind: input, shape index: {}]   ;;  %s2523_s6 = inlined_call_operand.vmem [shape: f32[128,128], index: 6, kind: input, shape index: {}]   ;;  %s2524_s7 = inlined_call_operand.vmem [shape: f32[1,128], index: 7, kind: input, shape index: {}]   ;;  %s2525_s8 = inlined_call_operand.vmem [shape: f32[4,128], index: 8, kind: input, shape index: {}]   ;;  %s2526_s9 = inlined_call_operand.hbm [shape: f32[2,24,128], index: 9, kind: output, shape index: {0}]   ;;  %s2527_s10 = inlined_call_operand.hbm [shape: f32[2,24,128], index: 10, kind: output, shape index: {1}]  }
   0x1   :  { %v1873_v0 = vld [vmem:[%s2517_s0 + $0x8] sm:$0xff]  ;;  %v1878_v1 = vld [vmem:[%s2517_s0] sm:$0xff]  ;;  %1672 = vset.pattern.permute.xlu0 %v1801_v2  ;;  %1674 = vset.pattern.permute.xlu1 %v1802_v3 }
   0x2   :  { %48 = vperm.xlu1 %1674, %v1873_v0   ;;  %70 = vperm.xlu0 %1672, %v1878_v1  }
   0x3   :  { %17 = vsyncpa [#allocation5], 0  ;;  %v1887_v4 = vld [vmem:[%s2517_s0 + $0x18] sm:$0xff]  ;;  %v1803_v5 = vmov 2   ;;  %v1894_v6 = vld [vmem:[%s2517_s0 + $0x10] sm:$0xff]  ;;  %v61_v7 = vlaneseq  ;;  %vm172_vm1 = vcmask 523264  }
   0x4   :  { %v40_v14 = vld [vmem:[%s2518_s1] sm:$0x7] }
   0x5   :  { %v147_v8 = vand.u32 127, %v61_v7  ;;  %v62_v9 = vshrl.u32 %v61_v7, 7 }
   0x6   :  { %1675 = vset.pattern.permute.xlu1 %v1801_v2  ;;  %1673 = vset.pattern.permute.xlu0 %v1802_v3 }
   0x7   :  { %74 = vperm.xlu1 %1675, %v1873_v0   ;;  %43 = vperm.xlu0 %1673, %v1878_v1   ;;  %v87_v10 = vsub.s32 1, %v62_v9  ;;  %v142_v11 = vcvt.s32.f32 %v62_v9  ;;  %v148_v12 = vcvt.s32.f32 %v147_v8  ;;  %v139_v13 = vadd.s32 8, %v62_v9 }
   0x8   :  { %v63_v15 = vsub.s32 0, %v62_v9  ;;  %v111_v23 = vsub.s32 2, %v62_v9  ;;  %v141_v40 = vadd.s32 24, %v62_v9  ;;  %v140_v46 = vadd.s32 16, %v62_v9 }
   0x9   :  { %v88_v18 = vrot.slane %v40_v14, %v87_v10  ;;  %v149_v19 = vadd.f32 0.5, %v142_v11  ;;  %v161_v20 = vadd.f32 0.5, %v148_v12  ;;  %v143_v21 = vcvt.s32.f32 %v139_v13 }
   0xa   :  { %v64_v24 = vrot.slane %v40_v14, %v63_v15  ;;  %v112_v32 = vrot.slane %v40_v14, %v111_v23  ;;  %v145_v49 = vcvt.s32.f32 %v141_v40  ;;  %v144_v57 = vcvt.s32.f32 %v140_v46 }
   0xb   :  { %1676 = vset.pattern.permute.xlu1 %v1803_v5  ;;  %58 = vperm.xlu0 %1673, %v1887_v4   ;;  %v153_v28 = vmul.f32 0.0625, %v149_v19  ;;  %v162_v29 = vmul.f32 0.03125, %v161_v20  ;;  %v150_v30 = vadd.f32 0.5, %v143_v21 }
   0xc   :  { %94 = vperm.xlu1 %1676, %v1878_v1   ;;  %v152_v59 = vadd.f32 0.5, %v145_v49 }
   0xd   :  { %v157_v37 = vfloor.f32 %v153_v28  ;;  %v163_v38 = vfloor.f32 %v162_v29  ;;  %v154_v39 = vmul.f32 0.0625, %v150_v30 }
   0xf   :  { %1679 = vset.pattern.permute.xlu0 %v1803_v5  ;;  %vm164_vm0 = vcmp.eq.f32.partialorder %v157_v37, %v163_v38  ;;  %v158_v48 = vfloor.f32 %v154_v39 }
  0x10   :  { %1677 = vset.pattern.permute.xlu1 %v1802_v3  ;;  %98 = vperm.xlu0 %1679, %v1873_v0  }
  0x11   :  { %53 = vperm.xlu1 %1677, %v1894_v6   ;;  %vm165_vm2 = vcmp.eq.f32.partialorder %v158_v48, %v163_v38 }
  0x14   :  { %106 = vperm.xlu0 %1679, %v1887_v4  }
  0x15   :  { %1678 = vset.pattern.permute.xlu1 %v1801_v2  ;;  %v151_v2 = vadd.f32 0.5, %v144_v57 }
  0x16   :  { %78 = vperm.xlu1 %1678, %v1894_v6  }
  0x17   :  { %v155_v12 = vmul.f32 0.0625, %v151_v2 }
  0x1a   :  { %82 = vperm.xlu1 %1678, %v1887_v4  }
  0x1e   :  { %1680 = vset.pattern.permute.xlu1 %v1803_v5  ;;  %v156_v5 = vmul.f32 0.0625, %v152_v59 }
  0x1f   :  { %102 = vperm.xlu1 %1680, %v1894_v6  }
  0x20   :  { %v160_v14 = vfloor.f32 %v156_v5 }
  0x22   :  { %vm167_vm3 = vcmp.eq.f32.partialorder %v160_v14, %v163_v38 }
  0x81   :  { %v49_v16 = vpop.permute.xlu1 %48  ;;  %v71_v17 = vpop.permute.xlu0 %70 }
  0x82   :  { %v89_v22 = vsub.f32 %v71_v17, %v88_v18  ;;  %v66_v41 = vsub.f32 %v49_v16, %v64_v24 }
  0x84   :  { %v121_v31 = vmul.f32 %v89_v22, %v89_v22  ;;  %v118_v50 = vmul.f32 %v66_v41, %v66_v41  ;;  %v159_v22 = vfloor.f32 %v155_v12 }
  0x86   :  { %v75_v25 = vpop.permute.xlu1 %74  ;;  %v44_v26 = vpop.permute.xlu0 %43  ;;  %vm166_vm4 = vcmp.eq.f32.partialorder %v159_v22, %v163_v38 }
  0x87   :  { %v65_v27 = vsub.f32 %v44_v26, %v64_v24  ;;  %v90_v34 = vsub.f32 %v75_v25, %v88_v18 }
  0x89   :  { %v117_v33 = vmul.f32 %v65_v27, %v65_v27  ;;  %v122_v44 = vmul.f32 %v90_v34, %v90_v34 }
  0x8a   :  { %v59_v35 = vpop.permute.xlu0 %58 }
  0x8b   :  { %v95_v36 = vpop.permute.xlu1 %94  ;;  %v125_v42 = vadd.f32 %v121_v31, %v117_v33  ;;  %v126_v54 = vadd.f32 %v122_v44, %v118_v50  ;;  %v68_v7 = vsub.f32 %v59_v35, %v64_v24 }
  0x8c   :  { %v113_v43 = vsub.f32 %v95_v36, %v112_v32 }
  0x8d   :  { %v120_v15 = vmul.f32 %v68_v7, %v68_v7 }
  0x8e   :  { %v129_v45 = vmul.f32 %v113_v43, %v113_v43 }
  0x8f   :  { %v99_v47 = vpop.permute.xlu0 %98 }
  0x90   :  { %v133_v51 = vadd.f32 %v129_v45, %v125_v42  ;;  %v114_v52 = vsub.f32 %v99_v47, %v112_v32  ;;  %v54_v53 = vpop.permute.xlu1 %53 }
  0x91   :  { %v67_v13 = vsub.f32 %v54_v53, %v64_v24 }
  0x92   :  { %v130_v55 = vmul.f32 %v114_v52, %v114_v52  ;;  %v1905_v56 = vsel %vm164_vm0, %v133_v51, 1e+30 }
  0x93   :  { %v173_v58 = vsel %vm172_vm1, %v1905_v56, inf  ;;  %v107_v62 = vpop.permute.xlu0 %106  ;;  %v119_v23 = vmul.f32 %v67_v13, %v67_v13 }
  0x94   :  { %v134_v60 = vadd.f32 %v130_v55, %v126_v54  ;;  %174 = vmin.xlane.f32.xlu1 %v173_v58  ;;  %v116_v8 = vsub.f32 %v107_v62, %v112_v32 }
  0x95   :  { %v79_v61 = vpop.permute.xlu1 %78 }
  0x96   :  { %v1909_v63 = vsel %vm165_vm2, %v134_v60, 1e+30  ;;  %v91_v9 = vsub.f32 %v79_v61, %v88_v18  ;;  %v132_v17 = vmul.f32 %v116_v8, %v116_v8 }
  0x97   :  { %v176_v3 = vsel %vm172_vm1, %v1909_v63, inf }
  0x98   :  { %177 = vmin.xlane.f32.xlu0 %v176_v3  ;;  %v123_v19 = vmul.f32 %v91_v9, %v91_v9 }
  0x99   :  { %v83_v10 = vpop.permute.xlu1 %82 }
  0x9a   :  { %v92_v11 = vsub.f32 %v83_v10, %v88_v18  ;;  %v127_v27 = vadd.f32 %v123_v19, %v119_v23 }
  0x9c   :  { %v124_v16 = vmul.f32 %v92_v11, %v92_v11 }
  0x9e   :  { %v128_v20 = vadd.f32 %v124_v16, %v120_v15  ;;  %v103_v21 = vpop.permute.xlu1 %102 }
  0x9f   :  { %v115_v25 = vsub.f32 %v103_v21, %v112_v32 }
  0xa0   :  { %v136_v26 = vadd.f32 %v132_v17, %v128_v20 }
  0xa1   :  { %v131_v28 = vmul.f32 %v115_v25, %v115_v25 }
  0xa2   :  { %v1913_v29 = vsel %vm167_vm3, %v136_v26, 1e+30 }
  0xa3   :  { %v135_v18 = vadd.f32 %v131_v28, %v127_v27  ;;  %v182_v24 = vsel %vm172_vm1, %v1913_v29, inf }
  0xa4   :  { %183 = vmin.xlane.f32.xlu0 %v182_v24 }
  0xa5   :  { %v1917_v30 = vsel %vm166_vm4, %v135_v18, 1e+30 }
  0xa6   :  { %v179_v31 = vsel %vm172_vm1, %v1917_v30, inf }
  0xa7   :  { %180 = vmin.xlane.f32.xlu1 %v179_v31 }
 0x121   :  { %v175_v33 = vpop.xlane.xlu1 %174 }
 0x122   :  { %1681 = vrsqrt.f32 %v175_v33  ;;  %vm221_vm5 = vcmp.eq.f32.partialorder %v1905_v56, %v175_v33  ;;  %vm187_vm7 = vcmp.eq.f32.partialorder %v175_v33, inf  ;;  %v190_v40 = vand.u32 2147483648, %v175_v33 }
 0x123   :  { %v1925_v32 = vsel %vm221_vm5, 1e+30, %v1905_v56  ;;  %vm189_vm8 = vcmp.eq.f32.partialorder %v175_v33, 0.0 }
 0x124   :  { %v237_v34 = vsel %vm172_vm1, %v1925_v32, inf }
 0x125   :  { %v178_v35 = vpop.xlane.xlu0 %177  ;;  %238 = vmin.xlane.f32.xlu1 %v237_v34 }
 0x126   :  { %1683 = vrsqrt.f32 %v178_v35  ;;  %vm222_vm6 = vcmp.eq.f32.partialorder %v1909_v63, %v178_v35  ;;  %vm194_vm9 = vcmp.eq.f32.partialorder %v178_v35, inf  ;;  %v197_v47 = vand.u32 2147483648, %v178_v35 }
 0x127   :  { %v1933_v36 = vsel %vm222_vm6, 1e+30, %v1909_v63  ;;  %vm196_vm10 = vcmp.eq.f32.partialorder %v178_v35, 0.0 }
 0x128   :  { %v240_v37 = vsel %vm172_vm1, %v1933_v36, inf }
 0x129   :  { %241 = vmin.xlane.f32.xlu0 %v240_v37 }
 0x12c   :  { %v1682_v38 = vpop.eup %1681 }
 0x12d   :  { %v186_v39 = vmul.f32 %v1682_v38, %v175_v33 }
 0x12f   :  { %v188_v41 = vsel %vm187_vm7, %v175_v33, %v186_v39 }
 0x130   :  { %v1684_v42 = vpop.eup %1683  ;;  %v191_v43 = vsel %vm189_vm8, %v190_v40, %v188_v41 }
 0x131   :  { %v213_v44 = vadd.f32 1e-06, %v191_v43  ;;  %v193_v45 = vmul.f32 %v1684_v42, %v178_v35  ;;  %v1937_v46 = vpop.xlane.xlu0 %183 }
 0x132   :  { %vm224_vm11 = vcmp.eq.f32.partialorder %v1913_v29, %v1937_v46  ;;  %v211_v31 = vand.u32 2147483648, %v1937_v46  ;;  %vm210_vm8 = vcmp.eq.f32.partialorder %v1937_v46, 0.0 }
 0x133   :  { %1685 = vrcp.f32 %v213_v44  ;;  %v195_v48 = vsel %vm194_vm9, %v178_v35, %v193_v45  ;;  %v1947_v51 = vsel %vm224_vm11, 1e+30, %v1913_v29 }
 0x134   :  { %v198_v49 = vsel %vm196_vm10, %v197_v47, %v195_v48  ;;  %v1941_v50 = vpop.xlane.xlu1 %180  ;;  %v246_v53 = vsel %vm172_vm1, %v1947_v51, inf }
 0x135   :  { %v214_v52 = vadd.f32 1e-06, %v198_v49  ;;  %vm223_vm12 = vcmp.eq.f32.partialorder %v1917_v30, %v1941_v50  ;;  %247 = vmin.xlane.f32.xlu0 %v246_v53  ;;  %vm201_vm7 = vcmp.eq.f32.partialorder %v1941_v50, inf  ;;  %v204_v34 = vand.u32 2147483648, %v1941_v50 }
 0x136   :  { %v1957_v54 = vsel %vm223_vm12, 1e+30, %v1917_v30  ;;  %vm203_vm9 = vcmp.eq.f32.partialorder %v1941_v50, 0.0 }
 0x137   :  { %1687 = vrcp.f32 %v214_v52  ;;  %v243_v55 = vsel %vm172_vm1, %v1957_v54, inf }
 0x138   :  { %244 = vmin.xlane.f32.xlu1 %v243_v55 }
 0x13d   :  { %v1686_v57 = vpop.eup %1685 }
 0x13e   :  { %v1963_v58 = vsel %vm221_vm5, %v1686_v57, 0.0 }
 0x141   :  { %v1688_v59 = vpop.eup %1687 }
 0x142   :  { %v1967_v60 = vsel %vm222_vm6, %v1688_v59, 0.0  ;;  %vm208_vm6 = vcmp.eq.f32.partialorder %v1937_v46, inf }
 0x1b2   :  { %v239_v61 = vpop.xlane.xlu1 %238 }
 0x1b3   :  { %1689 = vrsqrt.f32 %v239_v61  ;;  %vm285_vm13 = vcmp.eq.f32.partialorder %v1925_v32, %v239_v61  ;;  %vm251_vm15 = vcmp.eq.f32.partialorder %v239_v61, inf  ;;  %v254_v8 = vand.u32 2147483648, %v239_v61 }
 0x1b4   :  { %v1973_v62 = vsel %vm285_vm13, 1e+30, %v1925_v32  ;;  %vm253_vm0 = vcmp.eq.f32.partialorder %v239_v61, 0.0 }
 0x1b5   :  { %v301_v2 = vsel %vm172_vm1, %v1973_v62, inf }
 0x1b6   :  { %v1977_v56 = vpop.xlane.xlu0 %241  ;;  %302 = vmin.xlane.f32.xlu1 %v301_v2 }
 0x1b7   :  { %1691 = vrsqrt.f32 %v1977_v56  ;;  %vm286_vm14 = vcmp.eq.f32.partialorder %v1933_v36, %v1977_v56  ;;  %vm258_vm2 = vcmp.eq.f32.partialorder %v1977_v56, inf  ;;  %v261_v15 = vand.u32 2147483648, %v1977_v56 }
 0x1b8   :  { %1693 = vrsqrt.f32 %v1937_v46  ;;  %v1987_v63 = vsel %vm286_vm14, 1e+30, %v1933_v36  ;;  %vm260_vm3 = vcmp.eq.f32.partialorder %v1977_v56, 0.0 }
 0x1b9   :  { %1695 = vrsqrt.f32 %v1941_v50  ;;  %v304_v3 = vsel %vm172_vm1, %v1987_v63, inf }
 0x1ba   :  { %305 = vmin.xlane.f32.xlu0 %v304_v3 }
 0x1bd   :  { %v1690_v5 = vpop.eup %1689 }
 0x1be   :  { %v250_v7 = vmul.f32 %v1690_v5, %v239_v61 }
 0x1c0   :  { %v252_v9 = vsel %vm251_vm15, %v239_v61, %v250_v7 }
 0x1c1   :  { %v1692_v10 = vpop.eup %1691  ;;  %v255_v11 = vsel %vm253_vm0, %v254_v8, %v252_v9 }
 0x1c2   :  { %v277_v12 = vadd.f32 1e-06, %v255_v11  ;;  %v257_v13 = vmul.f32 %v1692_v10, %v1977_v56  ;;  %v1694_v14 = vpop.eup %1693  ;;  %v1995_v16 = vpop.xlane.xlu0 %247 }
 0x1c3   :  { %v1696_v17 = vpop.eup %1695  ;;  %vm288_vm4 = vcmp.eq.f32.partialorder %v1947_v51, %v1995_v16  ;;  %v207_v22 = vmul.f32 %v1694_v14, %v1937_v46  ;;  %vm272_vm10 = vcmp.eq.f32.partialorder %v1995_v16, inf  ;;  %v275_v47 = vand.u32 2147483648, %v1995_v16 }
 0x1c4   :  { %1697 = vrcp.f32 %v277_v12  ;;  %v259_v19 = vsel %vm258_vm2, %v1977_v56, %v257_v13  ;;  %v200_v25 = vmul.f32 %v1696_v17, %v1941_v50  ;;  %v2008_v26 = vsel %vm288_vm4, 1e+30, %v1947_v51 }
 0x1c5   :  { %v262_v20 = vsel %vm260_vm3, %v261_v15, %v259_v19  ;;  %1699 = vrsqrt.f32 %v1995_v16  ;;  %v245_v21 = vpop.xlane.xlu1 %244  ;;  %v310_v27 = vsel %vm172_vm1, %v2008_v26, inf  ;;  %v209_v24 = vsel %vm208_vm6, %v1937_v46, %v207_v22 }
 0x1c6   :  { %v278_v23 = vadd.f32 1e-06, %v262_v20  ;;  %1701 = vrsqrt.f32 %v245_v21  ;;  %vm287_vm5 = vcmp.eq.f32.partialorder %v1957_v54, %v245_v21  ;;  %311 = vmin.xlane.f32.xlu0 %v310_v27  ;;  %v202_v33 = vsel %vm201_vm7, %v1941_v50, %v200_v25 }
 0x1c7   :  { %v2016_v28 = vsel %vm287_vm5, 1e+30, %v1957_v54  ;;  %v212_v35 = vsel %vm210_vm8, %v211_v31, %v209_v24  ;;  %v205_v38 = vsel %vm203_vm9, %v204_v34, %v202_v33  ;;  %vm274_vm15 = vcmp.eq.f32.partialorder %v1995_v16, 0.0 }
 0x1c8   :  { %1703 = vrcp.f32 %v278_v23  ;;  %v307_v18 = vsel %vm172_vm1, %v2016_v28, inf  ;;  %v216_v42 = vadd.f32 1e-06, %v212_v35  ;;  %v215_v45 = vadd.f32 1e-06, %v205_v38 }
 0x1c9   :  { %308 = vmin.xlane.f32.xlu1 %v307_v18  ;;  %vm265_vm0 = vcmp.eq.f32.partialorder %v245_v21, inf  ;;  %v268_v32 = vand.u32 2147483648, %v245_v21 }
 0x1ca   :  { %1705 = vrcp.f32 %v216_v42 }
 0x1cb   :  { %1707 = vrcp.f32 %v215_v45 }
 0x1ce   :  { %v1698_v37 = vpop.eup %1697 }
 0x1cf   :  { %v1700_v39 = vpop.eup %1699  ;;  %v289_v40 = vsel %vm285_vm13, %v1698_v37, 0.0  ;;  %vm267_vm13 = vcmp.eq.f32.partialorder %v245_v21, 0.0 }
 0x1d0   :  { %v1702_v41 = vpop.eup %1701  ;;  %v271_v43 = vmul.f32 %v1700_v39, %v1995_v16  ;;  %v2032_v44 = vadd.f32 %v289_v40, %v1963_v58 }
 0x1d1   :  { %v264_v48 = vmul.f32 %v1702_v41, %v245_v21 }
 0x1d2   :  { %v1704_v49 = vpop.eup %1703  ;;  %v273_v52 = vsel %vm272_vm10, %v1995_v16, %v271_v43 }
 0x1d3   :  { %v290_v53 = vsel %vm286_vm14, %v1704_v49, 0.0  ;;  %v266_v55 = vsel %vm265_vm0, %v245_v21, %v264_v48  ;;  %v276_v57 = vsel %vm274_vm15, %v275_v47, %v273_v52  ;;  %vm496_vm15 = vcmask 130048  }
 0x1d4   :  { %v280_v58 = vadd.f32 1e-06, %v276_v57  ;;  %v269_v59 = vsel %vm267_vm13, %v268_v32, %v266_v55  ;;  %v2042_v61 = vadd.f32 %v290_v53, %v1967_v60  ;;  %v1706_v3 = vpop.eup %1705  ;;  %v382_v32 = vld [vmem:[%s2520_s3 + $0x8] sm:$0xff]  ;;  %vm594_vm0 = vcmask 261120  }
 0x1d5   :  { %v279_v2 = vadd.f32 1e-06, %v269_v59  ;;  %v1708_v5 = vpop.eup %1707  ;;  %v228_v36 = vsel %vm224_vm11, %v1706_v3, 0.0  ;;  %v383_v59 = vld [vmem:[%s2520_s3 + $0x10] sm:$0xff]  ;;  %vm836_vm13 = vcmask 31744  }
 0x1d6   :  { %1709 = vrcp.f32 %v280_v58  ;;  %v227_v60 = vsel %vm223_vm12, %v1708_v5, 0.0  ;;  %v386_v5 = vld [vmem:[%s2520_s3 + $0x28] sm:$0xff] }
 0x1d7   :  { %1711 = vrcp.f32 %v279_v2  ;;  %v385_v2 = vld [vmem:[%s2520_s3 + $0x20] sm:$0xff] }
 0x1e0   :  { %v1710_v7 = vpop.eup %1709 }
 0x1e1   :  { %v1712_v8 = vpop.eup %1711  ;;  %v292_v56 = vsel %vm288_vm4, %v1710_v7, 0.0  ;;  %v1586_v7 = vpack.c.bf16 %v386_v5, %v385_v2 }
 0x1e2   :  { %v291_v9 = vsel %vm287_vm5, %v1712_v8, 0.0  ;;  %v2055_v10 = vadd.f32 %v292_v56, %v228_v36  ;;  %v387_v8 = vld [vmem:[%s2520_s3 + $0x30] sm:$0xff]  ;;  %v388_v36 = vld [vmem:[%s2520_s3 + $0x38] sm:$0xff] }
 0x1e3   :  { %v2057_v11 = vadd.f32 %v291_v9, %v227_v60  ;;  %v1590_v56 = vpack.c.bf16 %v388_v36, %v387_v8  ;;  %v486_v60 = vld [vmem:[%s2521_s4] sm:$0xff]  ;;  %v487_v9 = vld [vmem:[%s2521_s4 + $0x8] sm:$0xff] }
 0x243   :  { %v303_v12 = vpop.xlane.xlu1 %302 }
 0x244   :  { %1713 = vrsqrt.f32 %v303_v12  ;;  %vm315_vm11 = vcmp.eq.f32.partialorder %v303_v12, inf  ;;  %v318_v51 = vand.u32 2147483648, %v303_v12  ;;  %vm317_vm14 = vcmp.eq.f32.partialorder %v303_v12, 0.0 }
 0x245   :  { %vm349_vm3 = vcmp.eq.f32.partialorder %v1973_v62, %v303_v12 }
 0x247   :  { %v306_v13 = vpop.xlane.xlu0 %305 }
 0x248   :  { %1715 = vrsqrt.f32 %v306_v13  ;;  %vm322_vm12 = vcmp.eq.f32.partialorder %v306_v13, inf  ;;  %v325_v19 = vand.u32 2147483648, %v306_v13  ;;  %vm324_vm2 = vcmp.eq.f32.partialorder %v306_v13, 0.0 }
 0x249   :  { %vm350_vm8 = vcmp.eq.f32.partialorder %v1987_v63, %v306_v13  ;;  %v381_v63 = vld [vmem:[%s2520_s3] sm:$0xff] }
 0x24a   :  { %v1578_v57 = vpack.c.bf16 %v382_v32, %v381_v63 }
 0x24c   :  { %1579 = vmatprep.subr.bf16.mxu0 %v1578_v57 }
 0x24d   :  { %1581 = vmatpush3.bf16.msra.mxu0 %v1578_v57  ;;  %v820_v57 = vadd.f32 40.0, %v1873_v0 }
 0x24e   :  { %v1714_v29 = vpop.eup %1713 }
 0x24f   :  { %v314_v46 = vmul.f32 %v1714_v29, %v303_v12 }
 0x251   :  { %v316_v14 = vsel %vm315_vm11, %v303_v12, %v314_v46  ;;  %v495_v12 = vld [vmem:[%s2521_s4 + $0x28] sm:$0xff] }
 0x252   :  { %v1716_v15 = vpop.eup %1715  ;;  %v319_v30 = vsel %vm317_vm14, %v318_v51, %v316_v14 }
 0x253   :  { %v321_v50 = vmul.f32 %v1716_v15, %v306_v13  ;;  %v341_v16 = vadd.f32 1e-06, %v319_v30  ;;  %v312_v17 = vpop.xlane.xlu0 %311  ;;  %v488_v15 = vld [vmem:[%s2521_s4 + $0x10] sm:$0xff]  ;;  %v489_v30 = vld [vmem:[%s2521_s4 + $0x18] sm:$0xff] }
 0x254   :  { %vm336_vm4 = vcmp.eq.f32.partialorder %v312_v17, inf  ;;  %vm338_vm5 = vcmp.eq.f32.partialorder %v312_v17, 0.0  ;;  %v339_v33 = vand.u32 2147483648, %v312_v17  ;;  %vm352_vm9 = vcmp.eq.f32.partialorder %v2008_v26, %v312_v17 }
 0x255   :  { %v323_v54 = vsel %vm322_vm12, %v306_v13, %v321_v50  ;;  %1717 = vrcp.f32 %v341_v16 }
 0x256   :  { %1719 = vrsqrt.f32 %v312_v17  ;;  %v309_v20 = vpop.xlane.xlu1 %308  ;;  %v326_v21 = vsel %vm324_vm2, %v325_v19, %v323_v54 }
 0x257   :  { %1721 = vrsqrt.f32 %v309_v20  ;;  %v342_v22 = vadd.f32 1e-06, %v326_v21  ;;  %vm329_vm6 = vcmp.eq.f32.partialorder %v309_v20, inf  ;;  %v332_v37 = vand.u32 2147483648, %v309_v20 }
 0x258   :  { %vm331_vm7 = vcmp.eq.f32.partialorder %v309_v20, 0.0  ;;  %vm351_vm10 = vcmp.eq.f32.partialorder %v2016_v28, %v309_v20 }
 0x259   :  { %1723 = vrcp.f32 %v342_v22 }
 0x25f   :  { %v1718_v23 = vpop.eup %1717 }
 0x260   :  { %v1720_v25 = vpop.eup %1719  ;;  %v353_v27 = vsel %vm349_vm3, %v1718_v23, 0.0 }
 0x261   :  { %v1722_v18 = vpop.eup %1721  ;;  %v335_v24 = vmul.f32 %v1720_v25, %v312_v17  ;;  %v2061_v31 = vadd.f32 %v353_v27, %v2032_v44  ;;  %v490_v25 = vld [vmem:[%s2519_s2] sm:$0xff]  ;;  %v491_v27 = vld [vmem:[%s2519_s2 + $0x8] sm:$0xff] }
 0x262   :  { %v328_v34 = vmul.f32 %v1722_v18, %v309_v20  ;;  %1512 = vmatprep.mubr.msk.f32.mxu1 %vm496_vm15, %v490_v25  ;;  %v492_v18 = vld [vmem:[%s2519_s2 + $0x10] sm:$0xff] }
 0x263   :  { %v337_v35 = vsel %vm336_vm4, %v312_v17, %v335_v24  ;;  %v361_v38 = vsel %vm172_vm1, %v2061_v31, 0.0  ;;  %v1724_v40 = vpop.eup %1723  ;;  %v1602_v17 = vpack.c.bf16 %v489_v30, %v488_v15  ;;  %v493_v24 = vld [vmem:[%s2519_s2 + $0x18] sm:$0xff]  ;;  %v1412_v30 = vld [vmem:[%s2522_s5] ss:$0 sm:$0xff]  ;;  %s1811_s5 = smov [#allocation4]  }
 0x264   :  { %v330_v39 = vsel %vm329_vm6, %v309_v20, %v328_v34  ;;  %362 = vadd.xlane.f32.xlu1 %v361_v38  ;;  %v340_v62 = vsel %vm338_vm5, %v339_v33, %v337_v35  ;;  %v354_v43 = vsel %vm350_vm8, %v1724_v40, 0.0  ;;  %v707_v33 = vld [vmem:[%s2523_s6] sm:$0xff]  ;;  %v708_v34 = vld [vmem:[%s2523_s6 + $0x8] sm:$0xff]  ;;  %v709_v35 = vld [vmem:[%s2523_s6 + $0x10] sm:$0xff] }
 0x265   :  { %v344_v41 = vadd.f32 1e-06, %v340_v62  ;;  %v333_v42 = vsel %vm331_vm7, %v332_v37, %v330_v39  ;;  %v358_v45 = vadd.f32 %v354_v43, %v2042_v61  ;;  %v384_v61 = vld [vmem:[%s2520_s3 + $0x18] sm:$0xff]  ;;  %v1606_v37 = vpack.c.bf16 %v708_v34, %v707_v33  ;;  %v711_v62 = vld [vmem:[%s2523_s6 + $0x20] sm:$0xff]  ;;  %v712_v40 = vld [vmem:[%s2523_s6 + $0x28] sm:$0xff] }
 0x266   :  { %v343_v44 = vadd.f32 1e-06, %v333_v42  ;;  %v1582_v3 = vpack.c.bf16 %v384_v61, %v383_v59  ;;  %v710_v38 = vld [vmem:[%s2523_s6 + $0x18] sm:$0xff]  ;;  %v713_v42 = vld [vmem:[%s2523_s6 + $0x30] sm:$0xff]  ;;  %v822_v59 = vadd.f32 40.0, %v1887_v4 }
 0x267   :  { %1725 = vrcp.f32 %v344_v41  ;;  %v364_v47 = vsel %vm172_vm1, %v358_v45, 0.0  ;;  %v1610_v39 = vpack.c.bf16 %v710_v38, %v709_v35  ;;  %v1614_v41 = vpack.c.bf16 %v712_v40, %v711_v62  ;;  %v714_v43 = vld [vmem:[%s2523_s6 + $0x38] sm:$0xff] }
 0x268   :  { %1727 = vrcp.f32 %v343_v44  ;;  %365 = vadd.xlane.f32.xlu0 %v364_v47  ;;  %1583 = vmatprep.subr.bf16.mxu0 %v1582_v3  ;;  %v1618_v44 = vpack.c.bf16 %v714_v43, %v713_v42  ;;  %v716_v47 = vld [vmem:[%s2523_s6 + $0x48] sm:$0xff]  ;;  %v826_v5 = vfloor.f32 %v822_v59 }
 0x269   :  { %1585 = vmatpush3.bf16.msra.mxu0 %v1582_v3 }
 0x26a   :  { %1587 = vmatprep.subr.bf16.mxu0 %v1586_v7  ;;  %v830_v0 = vmax.f32 %v826_v5, 0.0 }
 0x26d   :  { %1589 = vmatpush3.bf16.msra.mxu0 %v1586_v7 }
 0x26e   :  { %1591 = vmatprep.subr.bf16.mxu0 %v1590_v56 }
 0x271   :  { %v1726_v48 = vpop.eup %1725  ;;  %1593 = vmatpush3.bf16.msra.mxu0 %v1590_v56 }
 0x272   :  { %v1728_v49 = vpop.eup %1727  ;;  %v356_v52 = vsel %vm352_vm9, %v1726_v48, 0.0 }
 0x273   :  { %v360_v53 = vadd.f32 %v356_v52, %v2055_v10  ;;  %v355_v55 = vsel %vm351_vm10, %v1728_v49, 0.0  ;;  %v494_v10 = vld [vmem:[%s2521_s4 + $0x20] sm:$0xff]  ;;  %v717_v49 = vld [vmem:[%s2523_s6 + $0x50] sm:$0xff]  ;;  %v718_v52 = vld [vmem:[%s2523_s6 + $0x58] sm:$0xff] }
 0x274   :  { %v359_v58 = vadd.f32 %v355_v55, %v2057_v11  ;;  %v1598_v11 = vpack.c.bf16 %v487_v9, %v486_v60  ;;  %v1594_v13 = vpack.c.bf16 %v495_v12, %v494_v10  ;;  %v1626_v63 = vpack.c.bf16 %v718_v52, %v717_v49  ;;  %v719_v9 = vld [vmem:[%s2523_s6 + $0x60] sm:$0xff]  ;;  %v720_v10 = vld [vmem:[%s2523_s6 + $0x68] sm:$0xff] }
 0x275   :  { %v370_v26 = vsel %vm172_vm1, %v360_v53, 0.0  ;;  %v819_v55 = vadd.f32 40.0, %v1878_v1  ;;  %v834_v60 = vmin.f32 %v830_v0, 79.0 }
 0x276   :  { %371 = vadd.xlane.f32.xlu0 %v370_v26  ;;  %v367_v28 = vsel %vm172_vm1, %v359_v58, 0.0  ;;  %1599 = vmatprep.subr.bf16.mxu0 %v1598_v11  ;;  %v821_v26 = vadd.f32 40.0, %v1894_v6 }
 0x277   :  { %368 = vadd.xlane.f32.xlu1 %v367_v28  ;;  %1595 = vmatprep.subr.bf16.mxu1 %v1594_v13  ;;  %v824_v28 = vfloor.f32 %v820_v57 }
 0x278   :  { %1597 = vmatpush3.bf16.msra.mxu1 %v1594_v13  ;;  %v825_v61 = vfloor.f32 %v821_v26  ;;  %v721_v13 = vld [vmem:[%s2523_s6 + $0x70] sm:$0xff] }
 0x279   :  { %1607 = vmatprep.subr.bf16.mxu1 %v1606_v37  ;;  %v828_v3 = vmax.f32 %v824_v28, 0.0 }
 0x27a   :  { %v829_v8 = vmax.f32 %v825_v61, 0.0 }
 0x27b   :  { %1513 = vmatmul.mubr.msk.f32.vlgmr.msra.gmra.mrb[0].mxu1 %vm496_vm15, %v491_v27  ;;  %v832_v56 = vmin.f32 %v828_v3, 79.0 }
 0x27c   :  { %1515 = vmatprep.mubr.msk.f32.mxu1 %vm496_vm15, %v492_v18  ;;  %1609 = vmatpush3.bf16.msra.mxu1 %v1606_v37  ;;  %v833_v6 = vmin.f32 %v829_v8, 79.0  ;;  %v1805_v8 = vmov 2475754826  }
 0x27d   :  { %1611 = vmatprep.subr.bf16.mxu1 %v1610_v39 }
 0x27f   :  { %1516 = vmatmul.mubr.msk.f32.gmra.mrb[2].mxu1 %vm496_vm15, %v493_v24 }
 0x280   :  { %1613 = vmatpush3.bf16.msra.mxu1 %v1610_v39 }
 0x281   :  { %1615 = vmatprep.subr.bf16.mxu1 %v1614_v41 }
 0x284   :  { %1617 = vmatpush3.bf16.msra.mxu1 %v1614_v41 }
 0x285   :  { %1619 = vmatprep.subr.bf16.mxu1 %v1618_v44 }
 0x288   :  { %1621 = vmatpush3.bf16.msra.mxu1 %v1618_v44 }
 0x2f1   :  { %v363_v29 = vpop.xlane.xlu1 %362 }
 0x2f2   :  { %1729 = vrcp.f32 %v363_v29  ;;  %v722_v29 = vld [vmem:[%s2523_s6 + $0x78] sm:$0xff] }
 0x2f5   :  { %v366_v46 = vpop.xlane.xlu0 %365 }
 0x2f6   :  { %1731 = vrcp.f32 %v366_v46  ;;  %v1634_v46 = vpack.c.bf16 %v722_v29, %v721_v13 }
 0x2fc   :  { %v1730_v51 = vpop.eup %1729 }
 0x2fd   :  { %v377_v14 = vmul.f32 %v1730_v51, %v2061_v31  ;;  %v835_v31 = vld [vmem:[%s2525_s8] sm:$0xf] }
 0x2ff   :  { %1502 = vmatprep.mubr.msk.f32.mxu0 %vm172_vm1, %v377_v14 }
 0x300   :  { %v1732_v50 = vpop.eup %1731 }
 0x301   :  { %v378_v54 = vmul.f32 %v1732_v50, %v358_v45  ;;  %v715_v45 = vld [vmem:[%s2523_s6 + $0x40] sm:$0xff]  ;;  %s1385_s6 = sshll.u32 %s1811_s5, 4  ;;  %s1386_s6 = int_to_ptr.vmem [resolvable:$true] %s1385_s6 }
 0x302   :  { %v1622_v48 = vpack.c.bf16 %v716_v47, %v715_v45  ;;  %s1753_s8 = scalar_lea.vmem %s1386_s6, 768  ;;  %p1758_p1 = scmp.lt.s32.totalorder %s1386_s6, %s1386_s6 }
 0x303   :  { %v372_v16 = vpop.xlane.xlu0 %371  ;;  %1503 = vmatmul.mubr.msk.f32.vlgmr.msra.gmra.mrb[0].mxu0 %vm172_vm1, %v378_v54  ;;  %p1754_p0 = scmp.ne.s32.totalorder %s1386_s6, %s1753_s8  ;;  %p1759_p2 = scmp.lt.s32.totalorder %s1753_s8, %s1753_s8 }
 0x304   :  { %1733 = vrcp.f32 %v372_v16  ;;  %v369_v19 = vpop.xlane.xlu1 %368  ;;  %1601 = vmatpush3.bf16.msra.mxu0 %v1598_v11  ;;  %1623 = vmatprep.subr.bf16.mxu1 %v1622_v48  ;;  %v1630_v11 = vpack.c.bf16 %v720_v10, %v719_v9 }
 0x305   :  { %1735 = vrcp.f32 %v369_v19  ;;  %1603 = vmatprep.subr.bf16.mxu0 %v1602_v17  ;;  %1625 = vmatpush3.bf16.msra.mxu1 %v1622_v48  ;;  %p1760_p3 = por %p1759_p2, %p1758_p1 }
 0x306   :  { %1627 = vmatprep.subr.bf16.mxu1 %v1626_v63 }
 0x307   :  { %p1761_p4 = pnand %p1760_p3, %p1754_p0 }
 0x308   :  { %1605 = vmatpush3.bf16.msra.mxu0 %v1602_v17 }
 0x309   :  { %1629 = vmatpush3.bf16.msra.mxu1 %v1626_v63 }
 0x30a   :  { %1631 = vmatprep.subr.bf16.mxu1 %v1630_v11 }
 0x30d   :  { %1633 = vmatpush3.bf16.msra.mxu1 %v1630_v11 }
 0x30e   :  { %v1734_v20 = vpop.eup %1733  ;;  %1635 = vmatprep.subr.bf16.mxu1 %v1634_v46 }
 0x30f   :  { %v1736_v21 = vpop.eup %1735  ;;  %v380_v23 = vmul.f32 %v1734_v20, %v360_v53 }
 0x310   :  { %v379_v22 = vmul.f32 %v1736_v21, %v359_v58  ;;  %v823_v58 = vfloor.f32 %v819_v55 }
 0x311   :  { %1637 = vmatpush3.bf16.msra.mxu1 %v1634_v46 }
 0x312   :  { %1505 = vmatprep.mubr.msk.f32.mxu0 %vm172_vm1, %v379_v22  ;;  %v827_v2 = vmax.f32 %v823_v58, 0.0 }
 0x313   :  { %1506 = vmatmul.mubr.msk.f32.gmra.mrb[2].mxu0 %vm172_vm1, %v380_v23  ;;  %vm849_vm1 = vcmask 1043456  }
 0x314   :  { %1570 = vmatprep.subr.msk.mxu0 %vm849_vm1, %v835_v31  ;;  %v831_v1 = vmin.f32 %v827_v2, 79.0 }
 0x34e   :  { %v1514_v4 = vpop.f32.mrb[0].mxu1 }
 0x34f   :  { %v575_v12 = vpop.f32.mrb[1].mxu1 }
 0x352   :  { %v1517_v51 = vpop.f32.mrb[2].mxu1 }
 0x353   :  { %v585_v14 = vpop.f32.mrb[3].mxu1 }
 0x3d6   :  { %v1504_v32 = vpop.f32.mrb[0].mxu0 }
 0x3d7   :  { %v467_v53 = vpop.f32.mrb[1].mxu0 }
 0x3d8   :  { %1526 = vmatprep.mubr.msk.f32.mxu0 %vm594_vm0, %v467_v53 }
 0x3d9   :  { %1527 = vmatmul.mubr.msk.f32.vlgmr.msra.gmra.mrb[4].mxu0 %vm594_vm0, %v1504_v32 }
 0x3da   :  { %1571 = vmatpush3.msk.msra.mxu0 %vm849_vm1, %v835_v31 }
 0x3e6   :  { %v1507_v7 = vpop.f32.mrb[2].mxu0 }
 0x3e7   :  { %v477_v36 = vpop.f32.mrb[3].mxu0 }
 0x3e8   :  { %1529 = vmatprep.mubr.msk.f32.mxu0 %vm594_vm0, %v477_v36 }
 0x3e9   :  { %1530 = vmatmul.mubr.msk.f32.gmra.mrb[6].mxu0 %vm594_vm0, %v1507_v7  ;;  %v1804_v7 = vmov 683565275  }
 0x3ea   :  { %1572 = vmatprep.mubr.msk.f32.mxu0 %vm836_vm13, %v831_v1 }
 0x3ed   :  { %1573 = vmatmul.mubr.msk.f32.vlgmr.msra.gmra.mrb[8].mxu0 %vm836_vm13, %v832_v56  ;;  %v1806_v56 = vmov 2131351028  }
 0x3ee   :  { %1575 = vmatprep.mubr.msk.f32.mxu0 %vm836_vm13, %v833_v6  ;;  %v1807_v6 = vmov 2102212464  }
 0x3f1   :  { %1576 = vmatmul.mubr.msk.f32.gmra.mrb[10].mxu0 %vm836_vm13, %v834_v60 }
 0x4ac   :  { %v1528_v15 = vpop.f32.mrb[4].mxu0 }
 0x4ad   :  { %v679_v50 = vadd.f32 %v1528_v15, %v1514_v4  ;;  %v673_v16 = vpop.f32.mrb[5].mxu0  ;;  %v1808_v4 = vmov 920167782  }
 0x4ae   :  { %v674_v54 = vadd.f32 %v673_v16, %v575_v12 }
 0x4af   :  { %v700_v17 = vadd.f32 %v1412_v30, %v679_v50 }
 0x4b0   :  { %v699_v19 = vadd.f32 %v1412_v30, %v674_v54 }
 0x4b1   :  { %v704_v21 = vmax.f32 %v700_v17, 0.0 }
 0x4b2   :  { %v703_v20 = vmax.f32 %v699_v19, 0.0 }
 0x4b4   :  { %1564 = vmatprep.mubr.f32.mxu1 %v703_v20 }
 0x4b5   :  { %1565 = vmatmul.mubr.f32.vlgmr.msra.gmra.mrb[4].mxu1 %v704_v21 }
 0x4bc   :  { %v1531_v22 = vpop.f32.mrb[6].mxu0 }
 0x4bd   :  { %v689_v23 = vadd.f32 %v1531_v22, %v1517_v51  ;;  %v683_v25 = vpop.f32.mrb[7].mxu0  ;;  %v1809_v51 = vmov 1326507024  }
 0x4be   :  { %v684_v27 = vadd.f32 %v683_v25, %v585_v14 }
 0x4bf   :  { %v702_v18 = vadd.f32 %v1412_v30, %v689_v23 }
 0x4c0   :  { %v701_v24 = vadd.f32 %v1412_v30, %v684_v27  ;;  %v2197_v31 = vpop.f32.mrb[8].mxu0 }
 0x4c1   :  { %v1042_v33 = vand.u32 2147483647, %v2197_v31  ;;  %v1045_v34 = vand.u32 2139095040, %v2197_v31  ;;  %v2201_v35 = vpop.f32.mrb[9].mxu0  ;;  %v706_v39 = vmax.f32 %v702_v18, 0.0  ;;  %vm1044_vm1 = vcmp.lt.s32.totalorder %v2197_v31, 0 }
 0x4c2   :  { %v705_v37 = vmax.f32 %v701_v24, 0.0  ;;  %v938_v38 = vand.u32 2147483647, %v2201_v35  ;;  %v941_v40 = vand.u32 2139095040, %v2201_v35 }
 0x4c3   :  { %v1046_v62 = vshrl.u32 %v1045_v34, 23  ;;  %v1049_v41 = vand.u32 8388607, %v1042_v33  ;;  %vm2307_vm0 = vcmp.le.f32.partialorder %v1042_v33, 0.7853982 }
 0x4c4   :  { %1567 = vmatprep.mubr.f32.mxu1 %v705_v37  ;;  %v945_v42 = vand.u32 8388607, %v938_v38  ;;  %v2209_v43 = vpop.f32.mrb[10].mxu0  ;;  %v942_v45 = vshrl.u32 %v941_v40, 23 }
 0x4c5   :  { %1568 = vmatmul.mubr.f32.gmra.mrb[6].mxu1 %v706_v39  ;;  %v1423_v44 = vadd.s32 4294967169, %v1046_v62  ;;  %v2211_v47 = vpop.f32.mrb[11].mxu0  ;;  %v1253_v48 = vand.u32 2139095040, %v2209_v43  ;;  %v1050_v63 = vor.u32 8388608, %v1049_v41  ;;  %v1250_v3 = vand.u32 2147483647, %v2209_v43 }
 0x4c6   :  { %v1419_v52 = vadd.s32 4294967169, %v942_v45  ;;  %v946_v32 = vor.u32 8388608, %v945_v42 }
 0x4c7   :  { %v1052_v49 = vadd.s32 1, %v1423_v44  ;;  %v1254_v53 = vshrl.u32 %v1253_v48, 23  ;;  %v2214_v59 = vshll.u32 %v1050_v63, 8 }
 0x4c8   :  { %v948_v55 = vadd.s32 1, %v1419_v52  ;;  %v2216_v2 = vshll.u32 %v946_v32, 8 }
 0x4c9   :  { %vm1053_vm11 = vcmp.gt.s32.totalorder %v1052_v49, 0  ;;  %v1431_v58 = vadd.s32 4294967169, %v1254_v53 }
 0x4ca   :  { %v1054_v57 = vsel %vm1053_vm11, %v1052_v49, 0  ;;  %vm949_vm14 = vcmp.gt.s32.totalorder %v948_v55, 0 }
 0x4cb   :  { %v1055_v26 = vshrl.u32 %v1054_v57, 5  ;;  %v1056_v28 = vand.u32 31, %v1054_v57  ;;  %v950_v61 = vsel %vm949_vm14, %v948_v55, 0  ;;  %v2224_v10 = vadd.s32 1, %v1431_v58 }
 0x4cc   :  { %v951_v17 = vshrl.u32 %v950_v61, 5  ;;  %v952_v19 = vand.u32 31, %v950_v61 }
 0x4cd   :  { %v1057_v5 = vsub.s32 32, %v1056_v28  ;;  %v1059_v1 = vshll.u32 %v1804_v7, %v1056_v28  ;;  %v1062_v36 = vshll.u32 %v1805_v8, %v1056_v28  ;;  %v1065_v0 = vshll.u32 %v1806_v56, %v1056_v28 }
 0x4ce   :  { %v1068_v60 = vshll.u32 %v1807_v6, %v1056_v28  ;;  %v1071_v9 = vshll.u32 %v1808_v4, %v1056_v28  ;;  %vm1074_vm12 = vcmp.lt.s32.totalorder %v1055_v26, 1  ;;  %vm1075_vm2 = vcmp.lt.s32.totalorder %v1055_v26, 2 }
 0x4cf   :  { %v1058_v11 = vshrl.u32 %v1804_v7, %v1057_v5  ;;  %v1060_v12 = vshrl.u32 %v1805_v8, %v1057_v5  ;;  %v1063_v13 = vshrl.u32 %v1806_v56, %v1057_v5  ;;  %v1066_v29 = vshrl.u32 %v1807_v6, %v1057_v5 }
 0x4d0   :  { %v1069_v46 = vshrl.u32 %v1808_v4, %v1057_v5  ;;  %v1072_v14 = vshrl.u32 %v1809_v51, %v1057_v5  ;;  %vm1076_vm3 = vcmp.lt.s32.totalorder %v1055_v26, 3  ;;  %vm1077_vm4 = vcmp.lt.s32.totalorder %v1055_v26, 4 }
 0x4d1   :  { %v1061_v15 = vor.u32 %v1060_v12, %v1059_v1  ;;  %v1064_v30 = vor.u32 %v1063_v13, %v1062_v36  ;;  %v1067_v50 = vor.u32 %v1066_v29, %v1065_v0  ;;  %v953_v24 = vsub.s32 32, %v952_v19 }
 0x4d2   :  { %v1070_v16 = vor.u32 %v1069_v46, %v1068_v60  ;;  %v1073_v54 = vor.u32 %v1072_v14, %v1071_v9  ;;  %v955_v62 = vshll.u32 %v1804_v7, %v952_v19  ;;  %v958_v32 = vshll.u32 %v1805_v8, %v952_v19 }
 0x4d3   :  { %v1078_v20 = vsel %vm1074_vm12, %v1058_v11, %v1061_v15  ;;  %v1079_v21 = vsel %vm1077_vm4, %v1067_v50, 2102212464  ;;  %v1082_v22 = vsel %vm1074_vm12, %v1061_v15, %v1064_v30  ;;  %v1086_v23 = vsel %vm1074_vm12, %v1064_v30, %v1067_v50 }
 0x4d4   :  { %v1080_v25 = vsel %vm1076_vm3, %v1064_v30, %v1079_v21  ;;  %v1083_v27 = vsel %vm1077_vm4, %v1070_v16, 920167782  ;;  %v1087_v18 = vsel %vm1077_vm4, %v1073_v54, 1326507024  ;;  %v954_v44 = vshrl.u32 %v1804_v7, %v953_v24 }
 0x4d5   :  { %v1081_v34 = vsel %vm1075_vm2, %v1078_v20, %v1080_v25  ;;  %v1084_v37 = vsel %vm1076_vm3, %v1067_v50, %v1083_v27  ;;  %v1088_v39 = vsel %vm1076_vm3, %v1070_v16, %v1087_v18  ;;  %v956_v63 = vshrl.u32 %v1805_v8, %v953_v24 }
 0x4d6   :  { %v1085_v40 = vsel %vm1075_vm2, %v1082_v22, %v1084_v37  ;;  %v1089_v41 = vsel %vm1075_vm2, %v1086_v23, %v1088_v39  ;;  %v1097_v42 = vmul.u32 %v2214_v59, %v1081_v34  ;;  %v959_v53 = vshrl.u32 %v1806_v56, %v953_v24 }
 0x4d7   :  { %v2245_v45 = vmul.u32.u64.low %v2214_v59, %v1089_v41  ;;  %v2246_v48 = vmul.u32.u64.high %v2214_v59, %v1089_v41, %v2245_v45  ;;  %v2249_v49 = vmul.u32.u64.low %v2214_v59, %v1085_v40  ;;  %v2250_v52 = vmul.u32.u64.high %v2214_v59, %v1085_v40, %v2249_v49 }
 0x4d8   :  { %v961_v55 = vshll.u32 %v1806_v56, %v952_v19  ;;  %v962_v57 = vshrl.u32 %v1807_v6, %v953_v24  ;;  %v964_v58 = vshll.u32 %v1807_v6, %v952_v19  ;;  %v965_v26 = vshrl.u32 %v1808_v4, %v953_v24 }
 0x4d9   :  { %v967_v28 = vshll.u32 %v1808_v4, %v952_v19  ;;  %v957_v61 = vor.u32 %v956_v63, %v955_v62  ;;  %v960_v59 = vor.u32 %v959_v53, %v958_v32  ;;  %v968_v5 = vshrl.u32 %v1809_v51, %v953_v24 }
 0x4da   :  { %vm970_vm5 = vcmp.lt.s32.totalorder %v951_v17, 1  ;;  %vm1099_vm6 = vc.u32 %v2246_v48, %v2249_v49  ;;  %v1100_v1 = vadd.s32 1, %v2250_v52  ;;  %v963_v36 = vor.u32 %v962_v57, %v961_v55 }
 0x4db   :  { %vm1261_vm7 = vcmp.gt.s32.totalorder %v2224_v10, 0  ;;  %v966_v0 = vor.u32 %v965_v26, %v964_v58  ;;  %v969_v60 = vor.u32 %v968_v5, %v967_v28  ;;  %vm971_vm8 = vcmp.lt.s32.totalorder %v951_v17, 2 }
 0x4dc   :  { %vm972_vm9 = vcmp.lt.s32.totalorder %v951_v17, 3  ;;  %v1101_v9 = vsel %vm1099_vm6, %v1100_v1, %v2250_v52  ;;  %vm973_vm10 = vcmp.lt.s32.totalorder %v951_v17, 4  ;;  %v974_v11 = vsel %vm970_vm5, %v954_v44, %v957_v61 }
 0x4dd   :  { %v978_v12 = vsel %vm970_vm5, %v957_v61, %v960_v59  ;;  %v1102_v13 = vadd.s32 %v1101_v9, %v1097_v42  ;;  %v975_v29 = vsel %vm973_vm10, %v963_v36, 2102212464  ;;  %v979_v46 = vsel %vm973_vm10, %v966_v0, 920167782 }
 0x4de   :  { %v982_v14 = vsel %vm970_vm5, %v960_v59, %v963_v36  ;;  %v976_v15 = vsel %vm972_vm9, %v960_v59, %v975_v29  ;;  %v980_v30 = vsel %vm972_vm9, %v963_v36, %v979_v46  ;;  %v983_v50 = vsel %vm973_vm10, %v969_v60, 1326507024 }
 0x4df   :  { %v1103_v16 = vadd.s32 536870912, %v1102_v13  ;;  %v981_v54 = vsel %vm971_vm8, %v978_v12, %v980_v30  ;;  %v984_v19 = vsel %vm972_vm9, %v966_v0, %v983_v50  ;;  %v1262_v20 = vsel %vm1261_vm7, %v2224_v10, 0 }
 0x4e0   :  { %v977_v21 = vsel %vm971_vm8, %v974_v11, %v976_v15  ;;  %v985_v22 = vsel %vm971_vm8, %v982_v14, %v984_v19  ;;  %v2277_v23 = vmul.u32.u64.low %v2216_v2, %v981_v54  ;;  %v2278_v25 = vmul.u32.u64.high %v2216_v2, %v981_v54, %v2277_v23 }
 0x4e1   :  { %v1104_v27 = vshrl.u32 %v1103_v16, 30  ;;  %v2282_v18 = vmul.u32.u64.low %v2216_v2, %v985_v22  ;;  %v2283_v24 = vmul.u32.u64.high %v2216_v2, %v985_v22, %v2282_v18  ;;  %v1257_v34 = vand.u32 8388607, %v1250_v3 }
 0x4e2   :  { %v1264_v37 = vand.u32 31, %v1262_v20  ;;  %v1149_v10 = vand.u32 2139095040, %v2211_v47  ;;  %v993_v17 = vmul.u32 %v2216_v2, %v977_v21  ;;  %v996_v62 = vadd.s32 1, %v2278_v25 }
 0x4e3   :  { %v1105_v39 = vshll.u32 %v1104_v27, 30  ;;  %vm995_vm15 = vc.u32 %v2283_v24, %v2277_v23  ;;  %v1258_v42 = vor.u32 8388608, %v1257_v34  ;;  %v1146_v44 = vand.u32 2147483647, %v2211_v47 }
 0x4e4   :  { %v1265_v40 = vsub.s32 32, %v1264_v37  ;;  %v997_v45 = vsel %vm995_vm15, %v996_v62, %v2278_v25  ;;  %v1267_v52 = vshll.u32 %v1804_v7, %v1264_v37  ;;  %v1270_v63 = vshll.u32 %v1805_v8, %v1264_v37 }
 0x4e5   :  { %v2290_v41 = vsub.s32 %v1102_v13, %v1105_v39  ;;  %v1150_v2 = vshrl.u32 %v1149_v10, 23  ;;  %v998_v53 = vadd.s32 %v997_v45, %v993_v17  ;;  %v1263_v58 = vshrl.u32 %v1262_v20, 5 }
 0x4e6   :  { %v1268_v55 = vshrl.u32 %v1805_v8, %v1265_v40  ;;  %v1271_v57 = vshrl.u32 %v1806_v56, %v1265_v40  ;;  %v1273_v26 = vshll.u32 %v1806_v56, %v1264_v37  ;;  %v1274_v28 = vshrl.u32 %v1807_v6, %v1265_v40 }
 0x4e7   :  { %v1108_v32 = vsub.s32 0, %v2290_v41  ;;  %v1276_v61 = vshll.u32 %v1807_v6, %v1264_v37  ;;  %v999_v1 = vadd.s32 536870912, %v998_v53  ;;  %v2312_v36 = vshll.u32 %v1258_v42, 8 }
 0x4e8   :  { %v2316_v0 = vand.u32 8388607, %v1146_v44  ;;  %v1098_v60 = vadd.s32 %v2249_v49, %v2246_v48  ;;  %v1277_v9 = vshrl.u32 %v1808_v4, %v1265_v40  ;;  %v1279_v11 = vshll.u32 %v1808_v4, %v1264_v37 }
 0x4e9   :  { %v1424_v5 = vmin.u32 %v1108_v32, %v2290_v41  ;;  %v1280_v33 = vshrl.u32 %v1809_v51, %v1265_v40  ;;  %v1128_v13 = vsub.s32 4, %v1104_v27  ;;  %v1269_v29 = vor.u32 %v1268_v55, %v1267_v52 }
 0x4ea   :  { %v1272_v46 = vor.u32 %v1271_v57, %v1270_v63  ;;  %v2323_v14 = vshrl.u32 %v999_v1, 30  ;;  %v1275_v15 = vor.u32 %v1274_v28, %v1273_v26  ;;  %v1278_v30 = vor.u32 %v1277_v9, %v1276_v61 }
 0x4eb   :  { %v1110_v12 = vclz %v1424_v5  ;;  %vm1282_vm13 = vcmp.lt.s32.totalorder %v1263_v58, 1  ;;  %vm1284_vm11 = vcmp.lt.s32.totalorder %v1263_v58, 3  ;;  %vm1285_vm14 = vcmp.lt.s32.totalorder %v1263_v58, 4 }
 0x4ec   :  { %v1427_v16 = vadd.s32 4294967169, %v1150_v2  ;;  %v1001_v48 = vshll.u32 %v2323_v14, 30  ;;  %v1266_v49 = vshrl.u32 %v1804_v7, %v1265_v40  ;;  %v1281_v54 = vor.u32 %v1280_v33, %v1279_v11 }
 0x4ed   :  { %v1425_v50 = vadd.s32 4294967294, %v1110_v12  ;;  %v1291_v19 = vsel %vm1285_vm14, %v1278_v30, 920167782  ;;  %v1129_v20 = vsel %vm1044_vm1, %v1128_v13, %v1104_v27  ;;  %vm1283_vm2 = vcmp.lt.s32.totalorder %v1263_v58, 2 }
 0x4ee   :  { %v1290_v21 = vsel %vm1282_vm13, %v1269_v29, %v1272_v46  ;;  %v2331_v25 = vsub.s32 %v998_v53, %v1001_v48  ;;  %v1287_v18 = vsel %vm1285_vm14, %v1275_v15, 2102212464  ;;  %v1292_v34 = vsel %vm1284_vm11, %v1275_v15, %v1291_v19 }
 0x4ef   :  { %vm1426_vm12 = vcmp.lt.s32.totalorder %v1425_v50, 0  ;;  %v1294_v17 = vsel %vm1282_vm13, %v1272_v46, %v1275_v15  ;;  %v1131_v62 = vsel %vm2307_vm0, 0, %v1129_v20  ;;  %v1286_v40 = vsel %vm1282_vm13, %v1266_v49, %v1269_v29 }
 0x4f0   :  { %v1113_v22 = vsel %vm1426_vm12, 0, %v1425_v50  ;;  %v1004_v27 = vsub.s32 0, %v2331_v25  ;;  %v1295_v42 = vsel %vm1285_vm14, %v1281_v54, 1326507024  ;;  %v1288_v63 = vsel %vm1284_vm11, %v1272_v46, %v1287_v18 }
 0x4f1   :  { %v1114_v37 = vsub.s32 32, %v1113_v22  ;;  %v1115_v10 = vshll.u32 %v2290_v41, %v1113_v22  ;;  %v1118_v39 = vsub.s32 4294967266, %v1113_v22  ;;  %v1296_v2 = vsel %vm1284_vm11, %v1278_v30, %v1295_v42 }
 0x4f2   :  { %v1420_v41 = vmin.u32 %v1004_v27, %v2331_v25  ;;  %v1293_v32 = vsel %vm1283_vm2, %v1290_v21, %v1292_v34  ;;  %v1297_v53 = vsel %vm1283_vm2, %v1294_v17, %v1296_v2  ;;  %v1156_v55 = vadd.s32 1, %v1427_v16 }
 0x4f3   :  { %v1116_v45 = vshrl.u32 %v1098_v60, %v1114_v37  ;;  %v1119_v52 = vadd.s32 127, %v1118_v39  ;;  %v2348_v28 = vmul.u32.u64.low %v2312_v36, %v1297_v53  ;;  %v2349_v61 = vmul.u32.u64.high %v2312_v36, %v1297_v53, %v2348_v28 }
 0x4f4   :  { %v1135_v5 = vadd.s32 3, %v1131_v62  ;;  %v1006_v1 = vclz %v1420_v41  ;;  %v1289_v60 = vsel %vm1283_vm2, %v1286_v40, %v1288_v63  ;;  %vm940_vm3 = vcmp.lt.s32.totalorder %v2201_v35, 0 }
 0x4f5   :  { %v1117_v57 = vor.u32 %v1116_v45, %v1115_v10  ;;  %v1120_v26 = vshll.u32 %v1119_v52, 23  ;;  %v2353_v33 = vmul.u32.u64.low %v2312_v36, %v1293_v32  ;;  %v2354_v12 = vmul.u32.u64.high %v2312_v36, %v1293_v32, %v2353_v33 }
 0x4f6   :  { %v1421_v13 = vadd.s32 4294967294, %v1006_v1  ;;  %v1154_v29 = vor.u32 8388608, %v2316_v0  ;;  %vm1157_vm4 = vcmp.gt.s32.totalorder %v1156_v55, 0  ;;  %v994_v15 = vadd.s32 %v2277_v23, %v2283_v24 }
 0x4f7   :  { %v1121_v9 = vor.u32 4788187, %v1120_v26  ;;  %v1124_v11 = vcvt.s32.f32 %v1117_v57  ;;  %v1024_v58 = vsub.s32 4, %v2323_v14  ;;  %v1158_v30 = vsel %vm1157_vm4, %v1156_v55, 0 }
 0x4f8   :  { %vm1422_vm5 = vcmp.lt.s32.totalorder %v1421_v13, 0  ;;  %v1305_v50 = vmul.u32 %v2312_v36, %v1289_v60  ;;  %vm1307_vm6 = vc.u32 %v2349_v61, %v2353_v33  ;;  %v1160_v16 = vand.u32 31, %v1158_v30 }
 0x4f9   :  { %v1122_v46 = vand.u32 2147483647, %v1121_v9  ;;  %v2365_v49 = vand.u32 3, %v1135_v5  ;;  %vm2369_vm7 = vcmp.le.f32.partialorder %v938_v38, 0.7853982  ;;  %v1009_v23 = vsel %vm1422_vm5, 0, %v1421_v13 }
 0x4fa   :  { %v1308_v24 = vadd.s32 1, %v2354_v12  ;;  %v1010_v19 = vsub.s32 32, %v1009_v23  ;;  %v1011_v20 = vshll.u32 %v2331_v25, %v1009_v23  ;;  %v1014_v36 = vsub.s32 4294967266, %v1009_v23 }
 0x4fb   :  { %v1125_v48 = vmul.f32 %v1124_v11, %v1122_v46  ;;  %v1161_v21 = vsub.s32 32, %v1160_v16  ;;  %v2378_v18 = vsel %vm940_vm3, %v1024_v58, %v2323_v14  ;;  %v2381_v38 = vshrl.u32 %v1158_v30, 5 }
 0x4fc   :  { %v1309_v34 = vsel %vm1307_vm6, %v1308_v24, %v2354_v12  ;;  %v1012_v37 = vshrl.u32 %v994_v15, %v1010_v19  ;;  %v1015_v10 = vadd.s32 127, %v1014_v36  ;;  %v1163_v62 = vshll.u32 %v1804_v7, %v1160_v16 }
 0x4fd   :  { %v1126_v22 = vxor.u32 2147483648, %v1125_v48  ;;  %v1310_v39 = vadd.s32 %v1309_v34, %v1305_v50  ;;  %v1162_v17 = vshrl.u32 %v1804_v7, %v1161_v21  ;;  %v1164_v27 = vshrl.u32 %v1805_v8, %v1161_v21 }
 0x4fe   :  { %v1166_v40 = vshll.u32 %v1805_v8, %v1160_v16  ;;  %v1013_v42 = vor.u32 %v1012_v37, %v1011_v20  ;;  %v1016_v45 = vshll.u32 %v1015_v10, 23  ;;  %v1167_v63 = vshrl.u32 %v1806_v56, %v1161_v21 }
 0x4ff   :  { %v1127_v25 = vsel %vm1044_vm1, %v1126_v22, %v1125_v48  ;;  %v1311_v52 = vadd.s32 536870912, %v1310_v39  ;;  %v1169_v2 = vshll.u32 %v1806_v56, %v1160_v16  ;;  %v1170_v41 = vshrl.u32 %v1807_v6, %v1161_v21 }
 0x500   :  { %v1130_v14 = vsel %vm2307_vm0, %v2197_v31, %v1127_v25  ;;  %v1017_v7 = vor.u32 4788187, %v1016_v45  ;;  %v1020_v32 = vcvt.s32.f32 %v1013_v42  ;;  %vm1141_vm8 = vcmp.eq.s32.totalorder %v2365_v49, 2 }
 0x501   :  { %1737 = vcosq.f32 %v1130_v14  ;;  %v2395_v53 = vshrl.u32 %v1311_v52, 30  ;;  %v1172_v8 = vshll.u32 %v1807_v6, %v1160_v16  ;;  %v1173_v59 = vshrl.u32 %v1808_v4, %v1161_v21 }
 0x502   :  { %1739 = vsinq.f32 %v1130_v14  ;;  %v1175_v55 = vshll.u32 %v1808_v4, %v1160_v16  ;;  %v1018_v57 = vand.u32 2147483647, %v1017_v7  ;;  %v1027_v56 = vsel %vm2369_vm7, 0, %v2378_v18 }
 0x503   :  { %v1313_v26 = vshll.u32 %v2395_v53, 30  ;;  %v1176_v28 = vshrl.u32 %v1809_v51, %v1161_v21  ;;  %v1165_v5 = vor.u32 %v1164_v27, %v1163_v62  ;;  %v1168_v1 = vor.u32 %v1167_v63, %v1166_v40 }
 0x504   :  { %v1171_v60 = vor.u32 %v1170_v41, %v1169_v2  ;;  %v1174_v9 = vor.u32 %v1173_v59, %v1172_v8  ;;  %vm1134_vm9 = vweird.f32 %v2197_v31  ;;  %v1021_v6 = vmul.f32 %v1020_v32, %v1018_v57 }
 0x505   :  { %v1314_v11 = vsub.s32 %v1310_v39, %v1313_v26  ;;  %v1177_v12 = vor.u32 %v1176_v28, %v1175_v55  ;;  %vm1178_vm10 = vcmp.lt.s32.totalorder %v2381_v38, 1  ;;  %vm1179_vm15 = vcmp.lt.s32.totalorder %v2381_v38, 2 }
 0x506   :  { %vm1181_vm1 = vcmp.lt.s32.totalorder %v2381_v38, 4  ;;  %v1182_v4 = vsel %vm1178_vm10, %v1162_v17, %v1165_v5  ;;  %v1194_v51 = vshll.u32 %v1154_v29, 8  ;;  %v1022_v13 = vxor.u32 2147483648, %v1021_v6 }
 0x507   :  { %v1316_v46 = vsub.s32 0, %v1314_v11  ;;  %vm1180_vm0 = vcmp.lt.s32.totalorder %v2381_v38, 3  ;;  %v1183_v15 = vsel %vm1181_vm1, %v1171_v60, 2102212464  ;;  %v1186_v30 = vsel %vm1178_vm10, %v1165_v5, %v1168_v1 }
 0x508   :  { %v1184_v58 = vsel %vm1180_vm0, %v1168_v1, %v1183_v15  ;;  %v1187_v50 = vsel %vm1181_vm1, %v1174_v9, 920167782  ;;  %v1191_v16 = vsel %vm1181_vm1, %v1177_v12, 1326507024  ;;  %v1023_v48 = vsel %vm940_vm3, %v1022_v13, %v1021_v6 }
 0x509   :  { %v1432_v23 = vmin.u32 %v1316_v46, %v1314_v11  ;;  %v1185_v24 = vsel %vm1179_vm15, %v1182_v4, %v1184_v58  ;;  %v1190_v0 = vsel %vm1178_vm10, %v1168_v1, %v1171_v60  ;;  %v1026_v19 = vsel %vm2369_vm7, %v2201_v35, %v1023_v48 }
 0x50a   :  { %v1188_v20 = vsel %vm1180_vm0, %v1171_v60, %v1187_v50  ;;  %v1192_v36 = vsel %vm1180_vm0, %v1174_v9, %v1191_v16  ;;  %v1201_v21 = vmul.u32 %v1194_v51, %v1185_v24  ;;  %vm1138_vm13 = vcmp.eq.s32.totalorder %v2365_v49, 0 }
 0x50b   :  { %v1738_v29 = vpop.eup %1737  ;;  %1741 = vcosq.f32 %v1026_v19  ;;  %v1318_v34 = vclz %v1432_v23  ;;  %vm1137_vm11 = vcmp.lt.s32.totalorder %v2365_v49, 2  ;;  %v1031_v10 = vadd.s32 3, %v1027_v56 }
 0x50c   :  { %v1740_v22 = vpop.eup %1739  ;;  %v1142_v18 = vxor.u32 2147483648, %v1738_v29  ;;  %1743 = vsinq.f32 %v1026_v19  ;;  %v1189_v54 = vsel %vm1179_vm15, %v1186_v30, %v1188_v20  ;;  %v1193_v25 = vsel %vm1179_vm15, %v1190_v0, %v1192_v36 }
 0x50d   :  { %v1139_v37 = vxor.u32 2147483648, %v1740_v22  ;;  %v1433_v17 = vadd.s32 4294967294, %v1318_v34  ;;  %v1306_v27 = vadd.s32 %v2353_v33, %v2349_v61  ;;  %v1032_v38 = vand.u32 3, %v1031_v10 }
 0x50e   :  { %v1143_v39 = vsel %vm1141_vm8, %v1142_v18, %v1740_v22  ;;  %v2436_v40 = vmul.u32.u64.low %v1194_v51, %v1193_v25  ;;  %v2437_v14 = vmul.u32.u64.high %v1194_v51, %v1193_v25, %v2436_v40  ;;  %vm1030_vm5 = vweird.f32 %v2201_v35 }
 0x50f   :  { %v1140_v62 = vsel %vm1138_vm13, %v1738_v29, %v1139_v37  ;;  %vm1434_vm14 = vcmp.lt.s32.totalorder %v1433_v17, 0  ;;  %v2439_v45 = vmul.u32.u64.low %v1194_v51, %v1189_v54  ;;  %v2440_v52 = vmul.u32.u64.high %v1194_v51, %v1189_v54, %v2439_v45 }
 0x510   :  { %v1144_v42 = vsel %vm1137_vm11, %v1140_v62, %v1143_v39  ;;  %v1321_v63 = vsel %vm1434_vm14, 0, %v1433_v17  ;;  %vm1037_vm2 = vcmp.eq.s32.totalorder %v1032_v38, 2  ;;  %vm1034_vm3 = vcmp.eq.s32.totalorder %v1032_v38, 0 }
 0x511   :  { %v1145_v49 = vsel %vm1134_vm9, nan, %v1144_v42  ;;  %v1322_v2 = vsub.s32 32, %v1321_v63  ;;  %v1323_v41 = vshll.u32 %v1314_v11, %v1321_v63  ;;  %v1326_v7 = vsub.s32 4294967266, %v1321_v63 }
 0x512   :  { %1357 = vst [vmem:[#allocation4 + $0x8] sm:$0xff] %v1145_v49  ;;  %vm1203_vm12 = vc.u32 %v2437_v14, %v2439_v45  ;;  %v1204_v32 = vadd.s32 1, %v2440_v52  ;;  %vm1033_vm4 = vcmp.lt.s32.totalorder %v1032_v38, 2  ;;  %v1336_v12 = vsub.s32 4, %v2395_v53 }
 0x513   :  { %v1324_v61 = vshrl.u32 %v1306_v27, %v1322_v2  ;;  %v1327_v33 = vadd.s32 127, %v1326_v7  ;;  %vm1252_vm6 = vcmp.lt.s32.totalorder %v2209_v43, 0  ;;  %vm2454_vm7 = vcmp.le.f32.partialorder %v1250_v3, 0.7853982 }
 0x514   :  { %v1205_v31 = vsel %vm1203_vm12, %v1204_v32, %v2440_v52  ;;  %v1337_v50 = vsel %vm1252_vm6, %v1336_v12, %v2395_v53  ;;  %vm1148_vm8 = vcmp.lt.s32.totalorder %v2211_v47, 0  ;;  %v1810_v16 = vmov 0.0  }
 0x515   :  { %v1742_v8 = vpop.eup %1741  ;;  %v1325_v59 = vor.u32 %v1324_v61, %v1323_v41  ;;  %v1328_v55 = vshll.u32 %v1327_v33, 23  ;;  %v1206_v26 = vadd.s32 %v1205_v31, %v1201_v21  ;;  %1358 = vst [vmem:[#allocation2 + $0x10] sm:$0xff] %v1810_v16  ;;  %1366 = vst [vmem:[#allocation2 + $0x28] sm:$0xff] %v1810_v16  ;;  %vm2462_vm9 = vcmp.le.f32.partialorder %v1146_v44, 0.7853982 }
 0x516   :  { %v1744_v57 = vpop.eup %1743  ;;  %v1038_v56 = vxor.u32 2147483648, %v1742_v8  ;;  %1359 = vst [vmem:[#allocation4 + $0x10] sm:$0xff] %v1810_v16  ;;  %1367 = vst [vmem:[#allocation4 + $0x28] sm:$0xff] %v1810_v16  ;;  %v1339_v29 = vsel %vm2454_vm7, 0, %v1337_v50  ;;  %v1202_v18 = vadd.s32 %v2439_v45, %v2437_v14  ;;  %vm1342_vm13 = vweird.f32 %v2209_v43 }
 0x517   :  { %v1035_v28 = vxor.u32 2147483648, %v1744_v57  ;;  %v1329_v5 = vor.u32 4788187, %v1328_v55  ;;  %v1332_v1 = vcvt.s32.f32 %v1325_v59  ;;  %v1207_v9 = vadd.s32 536870912, %v1206_v26 }
 0x518   :  { %v1039_v60 = vsel %vm1037_vm2, %v1038_v56, %v1744_v57  ;;  %v1343_v20 = vadd.s32 3, %v1339_v29  ;;  %vm1238_vm2 = vweird.f32 %v2211_v47 }
 0x519   :  { %v1036_v6 = vsel %vm1034_vm3, %v1742_v8, %v1035_v28  ;;  %v1330_v11 = vand.u32 2147483647, %v1329_v5  ;;  %v1208_v51 = vshrl.u32 %v1207_v9, 30 }
 0x51a   :  { %v1040_v4 = vsel %vm1033_vm4, %v1036_v6, %v1039_v60  ;;  %v1344_v22 = vand.u32 3, %v1343_v20 }
 0x51b   :  { %v1041_v13 = vsel %vm1030_vm5, nan, %v1040_v4  ;;  %v1333_v46 = vmul.f32 %v1332_v1, %v1330_v11  ;;  %v1209_v15 = vshll.u32 %v1208_v51, 30  ;;  %v1232_v58 = vsub.s32 4, %v1208_v51 }
 0x51c   :  { %1356 = vst [vmem:[#allocation4] sm:$0xff] %v1041_v13  ;;  %vm1349_vm15 = vcmp.eq.s32.totalorder %v1344_v22, 2  ;;  %vm1346_vm1 = vcmp.eq.s32.totalorder %v1344_v22, 0  ;;  %vm1345_vm0 = vcmp.lt.s32.totalorder %v1344_v22, 2 }
 0x51d   :  { %v1334_v35 = vxor.u32 2147483648, %v1333_v46  ;;  %v1210_v3 = vsub.s32 %v1206_v26, %v1209_v15  ;;  %v1233_v23 = vsel %vm1148_vm8, %v1232_v58, %v1208_v51 }
 0x51e   :  { %v1235_v53 = vsel %vm2462_vm9, 0, %v1233_v23 }
 0x51f   :  { %v1335_v24 = vsel %vm1252_vm6, %v1334_v35, %v1333_v46  ;;  %v1212_v19 = vsub.s32 0, %v1210_v3 }
 0x520   :  { %v1338_v0 = vsel %vm2454_vm7, %v2209_v43, %v1335_v24  ;;  %v1239_v43 = vadd.s32 3, %v1235_v53 }
 0x521   :  { %1745 = vcosq.f32 %v1338_v0  ;;  %v1428_v44 = vmin.u32 %v1212_v19, %v1210_v3 }
 0x522   :  { %1747 = vsinq.f32 %v1338_v0  ;;  %v1240_v8 = vand.u32 3, %v1239_v43 }
 0x523   :  { %v1214_v36 = vclz %v1428_v44 }
 0x524   :  { %vm1245_vm11 = vcmp.eq.s32.totalorder %v1240_v8, 2  ;;  %vm1242_vm14 = vcmp.eq.s32.totalorder %v1240_v8, 0  ;;  %vm1241_vm12 = vcmp.lt.s32.totalorder %v1240_v8, 2 }
 0x525   :  { %v1429_v21 = vadd.s32 4294967294, %v1214_v36 }
 0x527   :  { %vm1430_vm10 = vcmp.lt.s32.totalorder %v1429_v21, 0 }
 0x528   :  { %v1217_v34 = vsel %vm1430_vm10, 0, %v1429_v21 }
 0x529   :  { %v1218_v37 = vsub.s32 32, %v1217_v34  ;;  %v1219_v10 = vshll.u32 %v1210_v3, %v1217_v34  ;;  %v1222_v39 = vsub.s32 4294967266, %v1217_v34 }
 0x52b   :  { %v1746_v17 = vpop.eup %1745  ;;  %v1220_v62 = vshrl.u32 %v1202_v18, %v1218_v37  ;;  %v1223_v27 = vadd.s32 127, %v1222_v39 }
 0x52c   :  { %v1748_v54 = vpop.eup %1747  ;;  %v1350_v25 = vxor.u32 2147483648, %v1746_v17 }
 0x52d   :  { %v1347_v40 = vxor.u32 2147483648, %v1748_v54  ;;  %v1221_v52 = vor.u32 %v1220_v62, %v1219_v10  ;;  %v1224_v49 = vshll.u32 %v1223_v27, 23 }
 0x52e   :  { %v1351_v42 = vsel %vm1349_vm15, %v1350_v25, %v1748_v54 }
 0x52f   :  { %v1348_v14 = vsel %vm1346_vm1, %v1746_v17, %v1347_v40  ;;  %v1225_v63 = vor.u32 4788187, %v1224_v49  ;;  %v1228_v38 = vcvt.s32.f32 %v1221_v52 }
 0x530   :  { %v1352_v45 = vsel %vm1345_vm0, %v1348_v14, %v1351_v42 }
 0x531   :  { %v1353_v2 = vsel %vm1342_vm13, nan, %v1352_v45  ;;  %v1226_v41 = vand.u32 2147483647, %v1225_v63 }
 0x532   :  { %1365 = vst [vmem:[#allocation4 + $0x20] sm:$0xff] %v1353_v2 }
 0x533   :  { %v1229_v7 = vmul.f32 %v1228_v38, %v1226_v41 }
 0x535   :  { %v1230_v61 = vxor.u32 2147483648, %v1229_v7 }
 0x537   :  { %v1231_v33 = vsel %vm1148_vm8, %v1230_v61, %v1229_v7 }
 0x538   :  { %v1234_v32 = vsel %vm2462_vm9, %v2211_v47, %v1231_v33 }
 0x539   :  { %1749 = vcosq.f32 %v1234_v32 }
 0x53a   :  { %1751 = vsinq.f32 %v1234_v32 }
 0x543   :  { %v1750_v59 = vpop.eup %1749 }
 0x544   :  { %v1752_v55 = vpop.eup %1751  ;;  %v1246_v31 = vxor.u32 2147483648, %v1750_v59 }
 0x545   :  { %v1243_v57 = vxor.u32 2147483648, %v1752_v55 }
 0x546   :  { %v1247_v56 = vsel %vm1245_vm11, %v1246_v31, %v1752_v55 }
 0x547   :  { %v1244_v26 = vsel %vm1242_vm14, %v1750_v59, %v1243_v57 }
 0x548   :  { %v1248_v28 = vsel %vm1241_vm12, %v1244_v26, %v1247_v56 }
 0x549   :  { %v1249_v5 = vsel %vm1238_vm2, nan, %v1248_v28 }
 0x54a   :  { %1364 = vst [vmem:[#allocation4 + $0x18] sm:$0xff] %v1249_v5 }
 0x54b   :  { %1764 = shalt.err (!%p1761_p4)
}
 0x54c   :  { %s1765_s1 = scalar_lea.hbm %s2527_s10, 768 }
 0x54d   :  { %p1766_p5 = scmp.ne.s32.totalorder %s2527_s10, %s1765_s1  ;;  %p1769_p6 = scmp.lt.u32.totalorder %s1765_s1, %s2527_s10 }
 0x54f   :  { %p1771_p7 = pnand %p1769_p6, %p1766_p5 }
 0x551   :  { %1774 = shalt.err (!%p1771_p7)
}
 0x552   :  { %s1812_s4 = smov 128   ;;  %s1813_s26 = smov 8   ;;  %v1413_v47 = vld [vmem:[%s2524_s7] ss:$0 sm:$0xff] }
 0x553   :  { %1391 = dma.vmem_to_hbm [thread:$0]  %s1386_s6, 768, %s2527_s10, [#allocation5], %s1812_s4, %s1812_s4, %s1813_s26  }
 0x554   :  { %s1814_s11 = smov [#allocation2]  }
 0x555   :  { %s1373_s12 = sshll.u32 %s1814_s11, 4  ;;  %s1374_s12 = int_to_ptr.vmem [resolvable:$true] %s1373_s12 }
 0x556   :  { %s1775_s7 = scalar_lea.vmem %s1374_s12, 768  ;;  %p1780_p9 = scmp.lt.s32.totalorder %s1374_s12, %s1374_s12 }
 0x557   :  { %p1776_p8 = scmp.ne.s32.totalorder %s1374_s12, %s1775_s7  ;;  %p1781_p10 = scmp.lt.s32.totalorder %s1775_s7, %s1775_s7 }
 0x559   :  { %p1782_p11 = por %p1781_p10, %p1780_p9 }
 0x55b   :  { %p1783_p12 = pnand %p1782_p11, %p1776_p8 }
 0x588   :  { %v1566_v1 = vpop.f32.mrb[4].mxu1 }
 0x589   :  { %v802_v60 = vadd.f32 %v1566_v1, %v1413_v47  ;;  %v796_v9 = vpop.f32.mrb[5].mxu1 }
 0x58a   :  { %v797_v6 = vadd.f32 %v1413_v47, %v796_v9 }
 0x58b   :  { %v816_v11 = vmax.f32 %v802_v60, 0.0 }
 0x58c   :  { %v815_v12 = vmax.f32 %v797_v6, 0.0 }
 0x58d   :  { %1355 = vst [vmem:[#allocation2 + $0x8] sm:$0xff] %v816_v11 }
 0x58e   :  { %1354 = vst [vmem:[#allocation2] sm:$0xff] %v815_v12 }
 0x598   :  { %v1569_v4 = vpop.f32.mrb[6].mxu1 }
 0x599   :  { %v812_v51 = vadd.f32 %v1569_v4, %v1413_v47  ;;  %v806_v13 = vpop.f32.mrb[7].mxu1 }
 0x59a   :  { %v807_v46 = vadd.f32 %v1413_v47, %v806_v13 }
 0x59b   :  { %v818_v15 = vmax.f32 %v812_v51, 0.0 }
 0x59c   :  { %v817_v58 = vmax.f32 %v807_v46, 0.0 }
 0x59d   :  { %1362 = vst [vmem:[#allocation2 + $0x20] sm:$0xff] %v818_v15 }
 0x59e   :  { %1361 = vst [vmem:[#allocation2 + $0x18] sm:$0xff] %v817_v58 }
 0x59f   :  { %1786 = shalt.err (!%p1783_p12)
}
 0x5a0   :  { %s1787_s14 = scalar_lea.hbm %s2526_s9, 768 }
 0x5a1   :  { %p1788_p13 = scmp.ne.s32.totalorder %s2526_s9, %s1787_s14  ;;  %p1791_p0 = scmp.lt.u32.totalorder %s1787_s14, %s2526_s9 }
 0x5a3   :  { %p1793_p1 = pnand %p1791_p0, %p1788_p13 }
 0x5a5   :  { %1796 = shalt.err (!%p1793_p1)
}
 0x5a6   :  { %1379 = dma.vmem_to_hbm [thread:$0]  %s1374_s12, 768, %s2526_s9, [#allocation3], %s1812_s4, %s1812_s4, %s1813_s26  }
 0x5a7   :  { %1797 = dma.done.wait [#allocation3], 768  }
 0x5a8   :  { %1798 = vsyncadd [#allocation3], 4294966528 }
 0x5a9   :  { %1799 = dma.done.wait [#allocation5], 768  }
 0x5aa   :  { %1800 = vsyncadd [#allocation5], 4294966528 }
 0x5ab   :  { %1398 = vsyncpa [#allocation3], 1 }
 0x5ac   :  { %1399 = vsyncpa [#allocation5], 1 }

</bundles_post_ra>
